<compile_context>
chip_gen: v7x
topology: tpu7x:2x2x1
jax: 0.10.0
libtpu: 0.0.40
codegen_flags: <defaults>
</compile_context>

<pallas_src>
import jax
import jax.numpy as jnp
from jax import lax
from jax.experimental import pallas as pl
from jax.experimental.pallas import tpu as pltpu


def _round_up(x, m):
    return (x + m - 1) // m * m


# ----------------------------- Pallas kernel --------------------------------
def _head_kernel(x_ref, w1_ref, shift_ref, w2_ref, b2_ref, o_ref, patch_ref):
    """Fused conv3x3 -> BN(shift) -> SiLU -> conv1x1 for one output row tile.

    x_ref     : (H+2, W+2, Cin)   bf16 whole zero-padded image (VMEM resident;
                                  re-fetched only when the batch index changes)
    w1_ref    : (9*Cin, Cmid_p)   bf16 im2col 3x3 weights, BN scale folded in
    shift_ref : (1, Cmid_p)       f32 folded BN shift
    w2_ref    : (Cmid_p, Cout_p)  bf16 1x1 weights (zero padded)
    b2_ref    : (1, Cout_p)       f32 bias (zero padded)
    o_ref     : (TH*W, Cout_p)    bf16 lane-dense output row tile
    patch_ref : (TH*W, 9*Cin)     bf16 scratch: im2col patch for this tile
    """
    w = x_ref.shape[1] - 2
    cin = x_ref.shape[2]
    rows = o_ref.shape[0]
    th = rows // w

    r = pl.program_id(1)
    row0 = r * th
    if th % 8 == 0:
        row0 = pl.multiple_of(row0, 8)

    # im2col: 9 shifted (TH, W, Cin) halo-window views read straight from the
    # resident image ref (dynamic row offset), each stored to its own lane
    # band of the scratch (tap-major, then channel).  The whole 3x3 conv then
    # becomes ONE MXU contraction with K = 9*Cin; only one shifted view is
    # live at a time (bounded live range).
    for t in range(9):
        dy, dx = t // 3, t % 3
        win = x_ref[pl.ds(row0 + dy, th), dx:dx + w, :]
        patch_ref[:, t * cin:(t + 1) * cin] = win.reshape(rows, cin)

    # conv3x3 (BN scale folded into w1) -> f32 accumulation on the MXU.
    acc = jnp.dot(patch_ref[...], w1_ref[...],
                  preferred_element_type=jnp.float32)
    acc = acc + shift_ref[...]

    # SiLU: x * sigmoid(x); the divide goes to the EUP (approx reciprocal).
    act = acc * pl.reciprocal(1.0 + jnp.exp(-acc), approx=True)

    # conv1x1 == channel matmul (bf16 operands, f32 MXU accumulation) + bias.
    out = jnp.dot(act.astype(jnp.bfloat16), w2_ref[...],
                  preferred_element_type=jnp.float32) + b2_ref[...]
    o_ref[...] = out.astype(o_ref.dtype)


# ----------------------------- Tiling heuristics -----------------------------
def _vmem_limit_bytes():
    """Scoped-VMEM limit: ~half the chip's physical VMEM, clamped to
    [32 MiB, 96 MiB] (v5e/v6e: 128 MiB -> 64 MiB, v7x: 64 MiB -> 32 MiB)."""
    cap = 64 * 1024 * 1024
    try:
        cap = int(pltpu.get_tpu_info().vmem_capacity_bytes)
    except Exception:
        pass
    return max(32 * 1024 * 1024, min(96 * 1024 * 1024, cap // 2))


def _pick_row_tile(H, W, Cin, cmid_p, cout_p, budget_bytes):
    """Pick the row-tile height TH (a divisor of H).

    Footprint model counts the per-core VMEM live at once: double-buffered
    resident blocks (whole padded image + weights) plus per-step
    intermediates.  Prefers >= 2 row tiles per image (pipeline overlap and
    two TensorCores on v7x) unless the level is tiny, in which case the whole
    level is one step (per-step overhead dominates tiny levels)."""
    cin_l = _round_up(Cin, 128)
    cmid_l = _round_up(cmid_p, 128)
    cout_l = _round_up(cout_p, 128)

    resident = (
        2 * (H + 2) * _round_up(W + 2, 16) * cin_l * 2      # padded image x2, bf16
        + 2 * _round_up(9 * Cin, 16) * cmid_l * 2           # w1 x2 bufs, bf16
        + 2 * _round_up(cmid_p, 16) * cout_l * 2            # w2 x2 bufs, bf16
        + 4 * 8 * (cmid_l + cout_l) * 4)                    # shift / bias (f32)

    def step_bytes(th):
        rows = th * W
        rows8, rows16 = _round_up(rows, 8), _round_up(rows, 16)
        return (2 * rows16 * cout_l * 2                      # bf16 output x2 bufs
                + rows16 * _round_up(9 * Cin, 128) * 2       # im2col patch scratch
                + rows8 * cmid_l * 4                         # f32 conv1 accumulator
                + rows16 * cmid_l * 2                        # bf16 activation
                + rows8 * cout_l * 4)                        # f32 conv2 pre-cast

    legal = [d for d in range(1, H + 1)
             if H % d == 0 and ((d * W) % 8 == 0 or d == H)]
    ok = [d for d in legal if resident + step_bytes(d) <= budget_bytes]
    if not ok:
        # Nothing fits the budget: take the smallest legal tile; the explicit
        # vmem_limit below fails loudly if even that is too big.
        return min(legal)
    tiled = [d for d in ok if d < H and d * W >= 128]
    if tiled and H * W >= 256:
        return max(tiled)
    return max(ok)


# ----------------------------- pallas_call wrapper ---------------------------
def _run_head_level(x_nchw, p):
    """x_nchw: (B, Cin, H, W) f32.  Returns (B, H*W, Cout_pad) bf16."""
    B, Cin, H, W = x_nchw.shape
    cmid_p, cout_p = p["cmid_pad"], p["cout_pad"]

    # Single fused preprocessing pass: NCHW -> NHWC, cast to bf16, 1-px zero
    # pad (conv padding=1).  No halo-window stacking / extra HBM copies.
    xp = jnp.pad(jnp.transpose(x_nchw, (0, 2, 3, 1)).astype(jnp.bfloat16),
                 ((0, 0), (1, 1), (1, 1), (0, 0)))

    vlim = _vmem_limit_bytes()
    th = _pick_row_tile(H, W, Cin, cmid_p, cout_p,
                        budget_bytes=(vlim * 3) // 4)
    R = H // th
    k9 = 9 * Cin

    grid_spec = pltpu.PrefetchScalarGridSpec(
        num_scalar_prefetch=0,
        grid=(B, R),
        in_specs=[
            # Whole padded image; block index depends only on b -> fetched
            # once per image and VMEM resident across all row tiles.
            pl.BlockSpec((None, H + 2, W + 2, Cin), lambda b, r: (b, 0, 0, 0)),
            # Weights: constant index_map -> VMEM resident across all steps.
            pl.BlockSpec((k9, cmid_p), lambda b, r: (0, 0)),
            pl.BlockSpec((1, cmid_p), lambda b, r: (0, 0)),
            pl.BlockSpec((cmid_p, cout_p), lambda b, r: (0, 0)),
            pl.BlockSpec((1, cout_p), lambda b, r: (0, 0)),
        ],
        out_specs=pl.BlockSpec((None, th * W, cout_p), lambda b, r: (b, r, 0)),
        scratch_shapes=[pltpu.VMEM((th * W, k9), jnp.bfloat16)],
    )
    return pl.pallas_call(
        _head_kernel,
        out_shape=jax.ShapeDtypeStruct((B, H * W, cout_p), jnp.bfloat16),
        grid_spec=grid_spec,
        compiler_params=pltpu.CompilerParams(
            dimension_semantics=("parallel", "parallel"),
            vmem_limit_bytes=vlim),
    )(xp, p["w1"], p["shift"], p["w2"], p["b2"])


# ----------------------------- Module params --------------------------------
def init_yolo_head_params(key, in_channels_list, num_classes, num_anchors):
    """Deterministic parameter init matching the PyTorch module's shapes,
    repacked for the kernel (BN scale folded into w1; im2col weight layout;
    Cout zero-padded to lane width; Cmid padded only when >= 128)."""
    params = []
    cout = num_anchors * (5 + num_classes)
    cout_p = _round_up(cout, 128)
    eps = 1e-5
    for cin in in_channels_list:
        cmid = cin // 2
        # Real YOLO channel counts give cmid in {128, 256, 512}: no padding.
        cmid_p = _round_up(cmid, 128) if cmid >= 128 else cmid
        key, k1, k2, k3, k4 = jax.random.split(key, 5)

        # Conv2d(cin, cmid, 3, padding=1, bias=False): weight (cmid, cin, 3, 3)
        w1_t = jax.random.normal(k1, (cmid, cin, 3, 3), jnp.float32) * 0.05
        # BatchNorm2d(cmid), eval-mode running stats folded to affine.
        gamma = 1.0 + 0.1 * jax.random.normal(k2, (cmid,), jnp.float32)
        beta = 0.1 * jax.random.normal(k3, (cmid,), jnp.float32)
        mean = jnp.zeros((cmid,), jnp.float32)
        var = jnp.ones((cmid,), jnp.float32)
        scale = gamma / jnp.sqrt(var + eps)
        shift = beta - mean * scale
        # Conv2d(cmid, cout, 1): weight (cout, cmid, 1, 1), bias (cout,)
        w2_t = jax.random.normal(k4, (cout, cmid, 1, 1), jnp.float32) * 0.05
        b2 = 0.01 * jnp.arange(cout, dtype=jnp.float32)

        # Fold BN scale into conv1 weights (per output channel).
        w1_scaled_t = w1_t * scale[:, None, None, None]       # (cmid, cin, 3, 3)
        # Kernel layout: im2col rows index = kh*3*Cin + kw*Cin + ci.
        w1_k = jnp.transpose(w1_scaled_t, (2, 3, 1, 0)).reshape(9 * cin, cmid)
        w1_k = jnp.pad(w1_k, ((0, 0), (0, cmid_p - cmid))).astype(jnp.bfloat16)
        shift_k = jnp.pad(shift, (0, cmid_p - cmid)).reshape(1, cmid_p)
        w2_k = jnp.transpose(w2_t[:, :, 0, 0], (1, 0))         # (cmid, cout)
        w2_k = jnp.pad(w2_k, ((0, cmid_p - cmid), (0, cout_p - cout)))
        w2_k = w2_k.astype(jnp.bfloat16)
        b2_k = jnp.pad(b2, (0, cout_p - cout)).reshape(1, cout_p)

        params.append(dict(
            w1=w1_k, shift=shift_k, w2=w2_k, b2=b2_k,
            cmid_pad=cmid_p, cout=cout, cout_pad=cout_p,
            # Precision-matched copies for the pure-JAX reference check.
            _w1_bf16=w1_scaled_t.astype(jnp.bfloat16),
            _w2_bf16=w2_t.astype(jnp.bfloat16),
            _shift=shift, _b2=b2,
        ))
    return params


def yolo_head_forward(inputs_nchw, params, num_classes, num_anchors):
    """inputs_nchw: list of (B, Cin_i, H_i, W_i).  Returns list of
    (B, num_anchors, H_i, W_i, 5 + num_classes), matching PyTorch."""
    outputs = []
    for x, p in zip(inputs_nchw, params):
        B, Cin, H, W = x.shape
        out_flat = _run_head_level(x, p)                     # (B, H*W, Cout_pad)
        out = out_flat[..., :p["cout"]].astype(jnp.float32)
        out = out.reshape(B, H, W, num_anchors, 5 + num_classes)
        out = jnp.transpose(out, (0, 3, 1, 2, 4))            # (B, A, H, W, 5+C)
        outputs.append(out)
    return outputs


# ----------------------------- Pure-JAX reference ----------------------------
def _reference_level(x_nchw, p):
    """Same math via XLA convs, precision-matched (bf16 operands, f32 acc)."""
    w1 = p["_w1_bf16"]
    dn1 = lax.conv_dimension_numbers(x_nchw.shape, w1.shape,
                                     ("NCHW", "OIHW", "NCHW"))
    y = lax.conv_general_dilated(x_nchw.astype(jnp.bfloat16), w1, (1, 1),
                                 ((1, 1), (1, 1)), dimension_numbers=dn1,
                                 preferred_element_type=jnp.float32)
    y = y + p["_shift"][None, :, None, None]
    y = y * jax.nn.sigmoid(y)
    w2 = p["_w2_bf16"]
    dn2 = lax.conv_dimension_numbers(y.shape, w2.shape,
                                     ("NCHW", "OIHW", "NCHW"))
    y = lax.conv_general_dilated(y.astype(jnp.bfloat16), w2, (1, 1), "VALID",
                                 dimension_numbers=dn2,
                                 preferred_element_type=jnp.float32)
    return y + p["_b2"][None, :, None, None]


if __name__ == "__main__":
    # Small shapes consistent with the module (scaled-down FPN levels).
    in_channels_list = [16, 32, 64]
    num_classes = 3
    num_anchors = 3
    B = 2
    spatial = [16, 8, 4]

    key = jax.random.PRNGKey(0)
    kx, kp = jax.random.split(key)
    inputs = []
    for cin, s in zip(in_channels_list, spatial):
        kx, sub = jax.random.split(kx)
        inputs.append(jax.random.normal(sub, (B, cin, s, s), jnp.float32))

    params = init_yolo_head_params(kp, in_channels_list, num_classes,
                                   num_anchors)

    outs = yolo_head_forward(inputs, params, num_classes, num_anchors)
    outs = [jax.block_until_ready(o) for o in outs]

    # Correctness check vs precision-matched pure-JAX reference.
    ok = True
    for x, p, o in zip(inputs, params, outs):
        ref = _reference_level(x, p)                         # (B, Cout, H, W)
        Bb, Cout, H, W = ref.shape
        ref = ref.reshape(Bb, num_anchors, 5 + num_classes, H, W)
        ref = jnp.transpose(ref, (0, 1, 3, 4, 2))
        if o.shape != ref.shape:
            ok = False
            break
        if not jnp.allclose(o, ref, atol=1e-2, rtol=1e-2):
            ok = False
            break

    print("KERNEL_OK" if ok else "MISMATCH")
</pallas_src>

<mosaic_0001>
module attributes {stable_mosaic.version = 11 : i64} {
  func.func @_head_kernel(%arg0: i32, %arg1: i32, %arg2: memref<1x18x18x16xbf16, #tpu.memory_space<vmem>>, %arg3: memref<144x8xbf16, #tpu.memory_space<vmem>>, %arg4: memref<1x8xf32, #tpu.memory_space<vmem>>, %arg5: memref<8x128xbf16, #tpu.memory_space<vmem>>, %arg6: memref<1x128xf32, #tpu.memory_space<vmem>>, %arg7: memref<1x128x128xbf16, #tpu.memory_space<vmem>>, %arg8: memref<128x144xbf16, #tpu.memory_space<vmem>>) attributes {dimension_semantics = [#tpu.dimension_semantics<parallel>, #tpu.dimension_semantics<parallel>], iteration_bounds = array<i64: 2, 2>, scalar_prefetch = 0 : i64, scratch_operands = 1 : i64, tpu.core_type = #tpu.core_type<tc>, window_params = [{transform_indices = @transform_0, window_bounds = array<i64: 1, 18, 18, 16>}, {pipeline_mode = #tpu.pipeline_mode<synchronous>, transform_indices = @transform_1, window_bounds = array<i64: 144, 8>}, {pipeline_mode = #tpu.pipeline_mode<synchronous>, transform_indices = @transform_2, window_bounds = array<i64: 1, 8>}, {pipeline_mode = #tpu.pipeline_mode<synchronous>, transform_indices = @transform_3, window_bounds = array<i64: 8, 128>}, {pipeline_mode = #tpu.pipeline_mode<synchronous>, transform_indices = @transform_4, window_bounds = array<i64: 1, 128>}, {transform_indices = @transform_5, window_bounds = array<i64: 1, 128, 128>}]} {
    %c8_i32 = arith.constant 8 : i32
    %0 = arith.muli %arg1, %c8_i32 : i32
    %1 = tpu.assume_multiple %0, 8 : i32
    %c0_i32 = arith.constant 0 : i32
    %2 = arith.addi %1, %c0_i32 : i32
    %c0 = arith.constant 0 : index
    %3 = arith.index_cast %2 : i32 to index
    %c0_0 = arith.constant 0 : index
    %c0_1 = arith.constant 0 : index
    %4 = vector.load %arg2[%c0, %3, %c0_0, %c0_1] : memref<1x18x18x16xbf16, #tpu.memory_space<vmem>>, vector<1x8x16x16xbf16>
    %5 = vector.shape_cast %4 : vector<1x8x16x16xbf16> to vector<8x16x16xbf16>
    %6 = vector.shape_cast %5 : vector<8x16x16xbf16> to vector<128x16xbf16>
    %c0_2 = arith.constant 0 : index
    %c0_3 = arith.constant 0 : index
    %7 = vector.load %arg8[%c0_2, %c0_3] : memref<128x144xbf16, #tpu.memory_space<vmem>>, vector<128x16xbf16>
    tpu.vector_store %arg8[%c0_2, %c0_3], %6 {strides = array<i32>} : memref<128x144xbf16, #tpu.memory_space<vmem>>, vector<128x16xbf16>,
    %c0_i32_4 = arith.constant 0 : i32
    %8 = arith.addi %1, %c0_i32_4 : i32
    %c0_5 = arith.constant 0 : index
    %9 = arith.index_cast %8 : i32 to index
    %c1 = arith.constant 1 : index
    %c0_6 = arith.constant 0 : index
    %10 = vector.load %arg2[%c0_5, %9, %c1, %c0_6] : memref<1x18x18x16xbf16, #tpu.memory_space<vmem>>, vector<1x8x16x16xbf16>
    %11 = vector.shape_cast %10 : vector<1x8x16x16xbf16> to vector<8x16x16xbf16>
    %12 = vector.shape_cast %11 : vector<8x16x16xbf16> to vector<128x16xbf16>
    %c0_7 = arith.constant 0 : index
    %c16 = arith.constant 16 : index
    %13 = vector.load %arg8[%c0_7, %c16] : memref<128x144xbf16, #tpu.memory_space<vmem>>, vector<128x16xbf16>
    tpu.vector_store %arg8[%c0_7, %c16], %12 {strides = array<i32>} : memref<128x144xbf16, #tpu.memory_space<vmem>>, vector<128x16xbf16>,
    %c0_i32_8 = arith.constant 0 : i32
    %14 = arith.addi %1, %c0_i32_8 : i32
    %c0_9 = arith.constant 0 : index
    %15 = arith.index_cast %14 : i32 to index
    %c2 = arith.constant 2 : index
    %c0_10 = arith.constant 0 : index
    %16 = vector.load %arg2[%c0_9, %15, %c2, %c0_10] : memref<1x18x18x16xbf16, #tpu.memory_space<vmem>>, vector<1x8x16x16xbf16>
    %17 = vector.shape_cast %16 : vector<1x8x16x16xbf16> to vector<8x16x16xbf16>
    %18 = vector.shape_cast %17 : vector<8x16x16xbf16> to vector<128x16xbf16>
    %c0_11 = arith.constant 0 : index
    %c32 = arith.constant 32 : index
    %19 = vector.load %arg8[%c0_11, %c32] : memref<128x144xbf16, #tpu.memory_space<vmem>>, vector<128x16xbf16>
    tpu.vector_store %arg8[%c0_11, %c32], %18 {strides = array<i32>} : memref<128x144xbf16, #tpu.memory_space<vmem>>, vector<128x16xbf16>,
    %c1_i32 = arith.constant 1 : i32
    %20 = arith.addi %1, %c1_i32 : i32
    %c0_12 = arith.constant 0 : index
    %21 = arith.index_cast %20 : i32 to index
    %c0_13 = arith.constant 0 : index
    %c0_14 = arith.constant 0 : index
    %22 = vector.load %arg2[%c0_12, %21, %c0_13, %c0_14] : memref<1x18x18x16xbf16, #tpu.memory_space<vmem>>, vector<1x8x16x16xbf16>
    %23 = vector.shape_cast %22 : vector<1x8x16x16xbf16> to vector<8x16x16xbf16>
    %24 = vector.shape_cast %23 : vector<8x16x16xbf16> to vector<128x16xbf16>
    %c0_15 = arith.constant 0 : index
    %c48 = arith.constant 48 : index
    %25 = vector.load %arg8[%c0_15, %c48] : memref<128x144xbf16, #tpu.memory_space<vmem>>, vector<128x16xbf16>
    tpu.vector_store %arg8[%c0_15, %c48], %24 {strides = array<i32>} : memref<128x144xbf16, #tpu.memory_space<vmem>>, vector<128x16xbf16>,
    %c1_i32_16 = arith.constant 1 : i32
    %26 = arith.addi %1, %c1_i32_16 : i32
    %c0_17 = arith.constant 0 : index
    %27 = arith.index_cast %26 : i32 to index
    %c1_18 = arith.constant 1 : index
    %c0_19 = arith.constant 0 : index
    %28 = vector.load %arg2[%c0_17, %27, %c1_18, %c0_19] : memref<1x18x18x16xbf16, #tpu.memory_space<vmem>>, vector<1x8x16x16xbf16>
    %29 = vector.shape_cast %28 : vector<1x8x16x16xbf16> to vector<8x16x16xbf16>
    %30 = vector.shape_cast %29 : vector<8x16x16xbf16> to vector<128x16xbf16>
    %c0_20 = arith.constant 0 : index
    %c64 = arith.constant 64 : index
    %31 = vector.load %arg8[%c0_20, %c64] : memref<128x144xbf16, #tpu.memory_space<vmem>>, vector<128x16xbf16>
    tpu.vector_store %arg8[%c0_20, %c64], %30 {strides = array<i32>} : memref<128x144xbf16, #tpu.memory_space<vmem>>, vector<128x16xbf16>,
    %c1_i32_21 = arith.constant 1 : i32
    %32 = arith.addi %1, %c1_i32_21 : i32
    %c0_22 = arith.constant 0 : index
    %33 = arith.index_cast %32 : i32 to index
    %c2_23 = arith.constant 2 : index
    %c0_24 = arith.constant 0 : index
    %34 = vector.load %arg2[%c0_22, %33, %c2_23, %c0_24] : memref<1x18x18x16xbf16, #tpu.memory_space<vmem>>, vector<1x8x16x16xbf16>
    %35 = vector.shape_cast %34 : vector<1x8x16x16xbf16> to vector<8x16x16xbf16>
    %36 = vector.shape_cast %35 : vector<8x16x16xbf16> to vector<128x16xbf16>
    %c0_25 = arith.constant 0 : index
    %c80 = arith.constant 80 : index
    %37 = vector.load %arg8[%c0_25, %c80] : memref<128x144xbf16, #tpu.memory_space<vmem>>, vector<128x16xbf16>
    tpu.vector_store %arg8[%c0_25, %c80], %36 {strides = array<i32>} : memref<128x144xbf16, #tpu.memory_space<vmem>>, vector<128x16xbf16>,
    %c2_i32 = arith.constant 2 : i32
    %38 = arith.addi %1, %c2_i32 : i32
    %c0_26 = arith.constant 0 : index
    %39 = arith.index_cast %38 : i32 to index
    %c0_27 = arith.constant 0 : index
    %c0_28 = arith.constant 0 : index
    %40 = vector.load %arg2[%c0_26, %39, %c0_27, %c0_28] : memref<1x18x18x16xbf16, #tpu.memory_space<vmem>>, vector<1x8x16x16xbf16>
    %41 = vector.shape_cast %40 : vector<1x8x16x16xbf16> to vector<8x16x16xbf16>
    %42 = vector.shape_cast %41 : vector<8x16x16xbf16> to vector<128x16xbf16>
    %c0_29 = arith.constant 0 : index
    %c96 = arith.constant 96 : index
    %43 = vector.load %arg8[%c0_29, %c96] : memref<128x144xbf16, #tpu.memory_space<vmem>>, vector<128x16xbf16>
    tpu.vector_store %arg8[%c0_29, %c96], %42 {strides = array<i32>} : memref<128x144xbf16, #tpu.memory_space<vmem>>, vector<128x16xbf16>,
    %c2_i32_30 = arith.constant 2 : i32
    %44 = arith.addi %1, %c2_i32_30 : i32
    %c0_31 = arith.constant 0 : index
    %45 = arith.index_cast %44 : i32 to index
    %c1_32 = arith.constant 1 : index
    %c0_33 = arith.constant 0 : index
    %46 = vector.load %arg2[%c0_31, %45, %c1_32, %c0_33] : memref<1x18x18x16xbf16, #tpu.memory_space<vmem>>, vector<1x8x16x16xbf16>
    %47 = vector.shape_cast %46 : vector<1x8x16x16xbf16> to vector<8x16x16xbf16>
    %48 = vector.shape_cast %47 : vector<8x16x16xbf16> to vector<128x16xbf16>
    %c0_34 = arith.constant 0 : index
    %c112 = arith.constant 112 : index
    %49 = vector.load %arg8[%c0_34, %c112] : memref<128x144xbf16, #tpu.memory_space<vmem>>, vector<128x16xbf16>
    tpu.vector_store %arg8[%c0_34, %c112], %48 {strides = array<i32>} : memref<128x144xbf16, #tpu.memory_space<vmem>>, vector<128x16xbf16>,
    %c2_i32_35 = arith.constant 2 : i32
    %50 = arith.addi %1, %c2_i32_35 : i32
    %c0_36 = arith.constant 0 : index
    %51 = arith.index_cast %50 : i32 to index
    %c2_37 = arith.constant 2 : index
    %c0_38 = arith.constant 0 : index
    %52 = vector.load %arg2[%c0_36, %51, %c2_37, %c0_38] : memref<1x18x18x16xbf16, #tpu.memory_space<vmem>>, vector<1x8x16x16xbf16>
    %53 = vector.shape_cast %52 : vector<1x8x16x16xbf16> to vector<8x16x16xbf16>
    %54 = vector.shape_cast %53 : vector<8x16x16xbf16> to vector<128x16xbf16>
    %c0_39 = arith.constant 0 : index
    %c128 = arith.constant 128 : index
    %55 = vector.load %arg8[%c0_39, %c128] : memref<128x144xbf16, #tpu.memory_space<vmem>>, vector<128x16xbf16>
    tpu.vector_store %arg8[%c0_39, %c128], %54 {strides = array<i32>} : memref<128x144xbf16, #tpu.memory_space<vmem>>, vector<128x16xbf16>,
    %c0_40 = arith.constant 0 : index
    %c0_41 = arith.constant 0 : index
    %56 = vector.load %arg8[%c0_40, %c0_41] : memref<128x144xbf16, #tpu.memory_space<vmem>>, vector<128x144xbf16>
    %c0_42 = arith.constant 0 : index
    %c0_43 = arith.constant 0 : index
    %57 = vector.load %arg3[%c0_42, %c0_43] : memref<144x8xbf16, #tpu.memory_space<vmem>>, vector<144x8xbf16>
    %cst = arith.constant dense<0.000000e+00> : vector<128x8xf32>
    %58 = tpu.matmul %56, %57, %cst {dimension_numbers = #tpu.dot_dimension_numbers<[1], [0], [0], [1], [0, 0, 1, 1], [], []>} : vector<128x144xbf16>, vector<144x8xbf16>, vector<128x8xf32> -> vector<128x8xf32>
    %c0_44 = arith.constant 0 : index
    %c0_45 = arith.constant 0 : index
    %59 = vector.load %arg4[%c0_44, %c0_45] : memref<1x8xf32, #tpu.memory_space<vmem>>, vector<1x8xf32>
    %60 = vector.broadcast %59 : vector<1x8xf32> to vector<128x8xf32>
    %61 = arith.addf %58, %60 : vector<128x8xf32>
    %cst_46 = arith.constant 0.000000e+00 : f32
    %62 = vector.broadcast %cst_46 : f32 to vector<128x8xf32>
    %63 = arith.subf %62, %61 : vector<128x8xf32>
    %64 = math.exp %63 : vector<128x8xf32>
    %cst_47 = arith.constant 1.000000e+00 : f32
    %65 = vector.broadcast %cst_47 : f32 to vector<128x8xf32>
    %66 = arith.addf %65, %64 : vector<128x8xf32>
    %67 = tpu.reciprocal %66 {approx = true} : vector<128x8xf32> -> vector<128x8xf32>
    %68 = arith.mulf %61, %67 : vector<128x8xf32>
    %69 = arith.truncf %68 : vector<128x8xf32> to vector<128x8xbf16>
    %c0_48 = arith.constant 0 : index
    %c0_49 = arith.constant 0 : index
    %70 = vector.load %arg5[%c0_48, %c0_49] : memref<8x128xbf16, #tpu.memory_space<vmem>>, vector<8x128xbf16>
    %cst_50 = arith.constant dense<0.000000e+00> : vector<128x128xf32>
    %71 = tpu.matmul %69, %70, %cst_50 {dimension_numbers = #tpu.dot_dimension_numbers<[1], [0], [0], [1], [0, 0, 1, 1], [], []>} : vector<128x8xbf16>, vector<8x128xbf16>, vector<128x128xf32> -> vector<128x128xf32>
    %c0_51 = arith.constant 0 : index
    %c0_52 = arith.constant 0 : index
    %72 = vector.load %arg6[%c0_51, %c0_52] : memref<1x128xf32, #tpu.memory_space<vmem>>, vector<1x128xf32>
    %73 = vector.broadcast %72 : vector<1x128xf32> to vector<128x128xf32>
    %74 = arith.addf %71, %73 : vector<128x128xf32>
    %75 = arith.truncf %74 : vector<128x128xf32> to vector<128x128xbf16>
    %c0_53 = arith.constant 0 : index
    %c0_54 = arith.constant 0 : index
    %c0_55 = arith.constant 0 : index
    %76 = vector.load %arg7[%c0_53, %c0_54, %c0_55] : memref<1x128x128xbf16, #tpu.memory_space<vmem>>, vector<1x128x128xbf16>
    %77 = vector.shape_cast %76 : vector<1x128x128xbf16> to vector<128x128xbf16>
    %78 = vector.shape_cast %75 : vector<128x128xbf16> to vector<1x128x128xbf16>
    tpu.vector_store %arg7[%c0_53, %c0_54, %c0_55], %78 {strides = array<i32>} : memref<1x128x128xbf16, #tpu.memory_space<vmem>>, vector<1x128x128xbf16>,
    return
  }
  func.func @transform_0(%arg0: i32, %arg1: i32) -> (i32, i32, i32, i32) {
    %c0_i32 = arith.constant 0 : i32
    %c0_i32_0 = arith.constant 0 : i32
    %c0_i32_1 = arith.constant 0 : i32
    %c0_i32_2 = arith.constant 0 : i32
    return %arg0, %c0_i32, %c0_i32_0, %c0_i32_1 : i32, i32, i32, i32
  }
  func.func @transform_1(%arg0: i32, %arg1: i32) -> (i32, i32) {
    %c0_i32 = arith.constant 0 : i32
    %c0_i32_0 = arith.constant 0 : i32
    %c0_i32_1 = arith.constant 0 : i32
    return %c0_i32, %c0_i32_0 : i32, i32
  }
  func.func @transform_2(%arg0: i32, %arg1: i32) -> (i32, i32) {
    %c0_i32 = arith.constant 0 : i32
    %c0_i32_0 = arith.constant 0 : i32
    %c0_i32_1 = arith.constant 0 : i32
    return %c0_i32, %c0_i32_0 : i32, i32
  }
  func.func @transform_3(%arg0: i32, %arg1: i32) -> (i32, i32) {
    %c0_i32 = arith.constant 0 : i32
    %c0_i32_0 = arith.constant 0 : i32
    %c0_i32_1 = arith.constant 0 : i32
    return %c0_i32, %c0_i32_0 : i32, i32
  }
  func.func @transform_4(%arg0: i32, %arg1: i32) -> (i32, i32) {
    %c0_i32 = arith.constant 0 : i32
    %c0_i32_0 = arith.constant 0 : i32
    %c0_i32_1 = arith.constant 0 : i32
    return %c0_i32, %c0_i32_0 : i32, i32
  }
  func.func @transform_5(%arg0: i32, %arg1: i32) -> (i32, i32, i32) {
    %c0_i32 = arith.constant 0 : i32
    %c0_i32_0 = arith.constant 0 : i32
    return %arg0, %arg1, %c0_i32 : i32, i32, i32
  }
}

</mosaic_0001>

<bundles_post_ra>
// kernel: tpu_custom_call.1
= control target key start
LH: loop header
LB: loop body
LE: loop exit
PB: predicated region body
PF: predicated region fallthrough
CT: control target
= control target key end

     0   :  { %10 = vsyncpa [#allocation4], 0  ;;  %s3942_s0 = inlined_call_operand.vmem [shape: bf16[2,18,18,16], index: 0, kind: input, shape index: {}]   ;;  %s3943_s1 = inlined_call_operand.vmem [shape: bf16[144,8], index: 1, kind: input, shape index: {}]   ;;  %s3944_s2 = inlined_call_operand.vmem [shape: f32[1,8], index: 2, kind: input, shape index: {}]   ;;  %s3945_s3 = inlined_call_operand.vmem [shape: bf16[8,128], index: 3, kind: input, shape index: {}]   ;;  %s3946_s4 = inlined_call_operand.vmem [shape: f32[1,128], index: 4, kind: input, shape index: {}]   ;;  %s3947_s5 = inlined_call_operand.hbm [shape: bf16[2,256,128], index: 5, kind: output, shape index: {}]  }
   0x1   :  { %12 = vsyncpa [#allocation4 + $0x1], 0  ;;  %s3140_s18 = smov 0   ;;  %s3142_s19 = smov 0  }
   0x2   :  { %s3144_s20 = smov 0   ;;  %s3146_s21 = smov 0  }
   0x3   :  { %s3148_s22 = smov 0   ;;  %s3150_s23 = smov 0  }
   0x4   :  { %s3152_s24 = smov 0   ;;  %s3154_s25 = smov 0  }
   0x5 LB: > { %s2429_s26 = sadd.s32 4294967295, %s3098_s25   ;;  %s2430_s27 = sadd.s32 4294967294, %s3098_s25   ;;  %s3098_s25 = sphi %s3154_s25, %s18_s25   ;;  %s3094_s24 = sphi %s3152_s24, %s3960_s24   ;;  %s3090_s23 = sphi %s3150_s23, %s3959_s23   ;;  %s3086_s22 = sphi %s3148_s22, %s3958_s22   ;;  %s3082_s21 = sphi %s3146_s21, %s3957_s21   ;;  %s3078_s20 = sphi %s3144_s20, %s3956_s20   ;;  %s3074_s19 = sphi %s3142_s19, %s3955_s19   ;;  %s3070_s18 = sphi %s3140_s18, %s3954_s18  }
   0x6   : > { %s27_s28 = sadd.s32 1, %s3090_s23  ;;  %s30_s29 = sadd.s32 1, %s3094_s24 }
   0x7   : > { %p28_p0 = scmp.ge.s32.totalorder %s27_s28, 2  ;;  %p159_p1 = scmp.ne.s32.totalorder %s3078_s20, %s3074_s19 }
   0x8   : > { %p160_p2 = scmp.eq.s32.totalorder %s2429_s26, 3  ;;  %p165_p5 = scmp.ne.s32.totalorder %s3074_s19, %s3070_s18 }
   0x9   : > { %s3962_s28 = smov (%p28_p0, %s27_s28), 0  ;;  %s3964_s29 = smov (!%p28_p0, %s30_s29), %s3094_s24 }
   0xa   : > { %s145_s30 = ssub.s32 %s3090_s23, %s3962_s28  ;;  %p3191_p3 = por %p160_p2, %p159_p1 }
   0xb   : > { %p32_p4 = scmp.ge.s32.totalorder %s3964_s29, 2  ;;  %p166_p6 = scmp.eq.s32.totalorder %s2430_s27, 3 }
   0xc   : > { %p2433_p7 = scmp.ge.s32.totalorder %s3098_s25, 1  ;;  %p204_p9 = scmp.lt.s32.totalorder %s3098_s25, 5 }
   0xd   : > { %s3966_s29 = smov (%p32_p4, %s3964_s29), 0  ;;  %p3200_p8 = por %p166_p6, %p165_p5 }
   0xe   : > { %s144_s8 = ssub.s32 %s3094_s24, %s3966_s29  ;;  %s149_s9 = sadd.s32 1, %s3078_s20 }
   0xf   : > { %s146_s10 = sor.u32 %s145_s30, %s144_s8  ;;  %p205_p10 = pnand %p2433_p7, %p204_p9 }
  0x10   : > { %p147_p11 = scmp.eq.s32.totalorder %s146_s10, 0  ;;  %p232_p12 = scmp.lt.s32.totalorder (!%p205_p10), %s3086_s22, 1  ;;  %vm640_vm0 = vcmask (!%p205_p10), 1042432   ;;  %vm641_vm1 = vcmask (!%p205_p10), 1046532   ;;  %vm340_vm3 = vsmask.f32 (!%p205_p10), 3328 }
  0x11   : > { %208 = sbr.rel (%p205_p10) target bundleno = 775 (0x307), region = 40  ;;  %vm3214_vm2 = vmor (!%p205_p10), %vm640_vm0, %vm641_vm1  ;;  %s3100_s27 = smov (!%p205_p10), 48   ;;  %vm341_vm4 = vsmask.f32 (!%p205_p10), 7440  ;;  %vm307_vm6 = vcmask (!%p205_p10), 130048   ;;  %vm583_vm7 = vcmask (!%p205_p10), 261248  }
  0x12   : > { %s3209_s11 = scalar_select %p147_p11, %s3078_s20, %s149_s9  }
  0x13   : > { %s2716_s13 = smul.u32 (!%p205_p10), 96, %s3082_s21  ;;  %s3101_s30 = smov (!%p205_p10), 96   ;;  %vm3269_vm5 = vmor (!%p205_p10), %vm340_vm3, %vm341_vm4  ;;  %vm747_vm8 = vcmask (!%p205_p10), 392448   ;;  %vm840_vm9 = vcmask (!%p205_p10), 523648   ;;  %vm1113_vm10 = vcmask (!%p205_p10), 654848   ;;  %vm1274_vm11 = vcmask (!%p205_p10), 786048  }
  0x14   : > { %s3102_s8 = smov (!%p205_p10), 32   ;;  %s3103_s9 = smov (!%p205_p10), 80   ;;  %vm1367_vm12 = vcmask (!%p205_p10), 917248   ;;  %vm1640_vm13 = vcmask (!%p205_p10), 1048448   ;;  %v2933_v0 = vld [vmem:[%s3943_s1 + $0x40] sm:$0xff] (!%p205_p10)   ;;  %vm2146_vm14 = vcmask (!%p205_p10), 1043456  }
  0x15   : > { %s3104_s10 = smov (!%p205_p10), 64   ;;  %vm2121_vm15 = vcmask (!%p205_p10), 64512  }
  0x18   : > { %s233_s12 = scalar_select %p232_p12, %s3086_s22, 1 }
  0x1a   : > { %s2826_s14 = smul.u32 216, %s233_s12  ;;  %s3105_s12 = smov 16  }
  0x1c   : > { %s236_s17 = scalar_lea.vmem %s3942_s0, %s2826_s14  ;;  %s2711_s14 = sshll.u32 %s3082_s21, 4 }
  0x1d   : > { %s3221_s26 = scalar_lea.vmem %s236_s17, %s2716_s13  ;;  %s3106_s13 = smov 112  }
  0x1e   : > { %v2907_v1 = vld [vmem:[%s3221_s26 + $0xc] sm:$0xff]   ;;  %v2908_v2 = vld [vmem:[%s3221_s26 + $0x18] sm:$0xff]   ;;  %v592_v3 = vld [vmem:[%s3221_s26] sm:$0xe] }
  0x1f   : > { %816 = vrot.lane.b32.xlu1 %v2907_v1, %s3100_s27  ;;  %v593_v4 = vld [vmem:[%s3221_s26 + $0x4] sm:$0xf]  ;;  %v594_v5 = vld [vmem:[%s3221_s26 + $0x8] sm:$0x1]  ;;  %v2455_v6 = vrot.slane %v592_v3, 9  ;;  %v2909_v16 = vld [vmem:[%s3221_s26 + $0x18] sm:$0xff]  }
  0x20   : > { %v645_v7 = vrot.slane %v593_v4, 5  ;;  %v648_v8 = vrot.slane %v594_v5, 5  ;;  %v2529_v9 = vld [vmem:[%s3221_s26 + $0xc] sm:$0xe]  ;;  %v2530_v10 = vld [vmem:[%s3221_s26 + $0x10] sm:$0xf] }
  0x21   : > { %v2531_v13 = vld [vmem:[%s3221_s26 + $0x14] sm:$0x1]  ;;  %v2553_v14 = vrot.slane %v2529_v9, 9  ;;  %v1172_v15 = vrot.slane %v2530_v10, 5  ;;  %v2532_v18 = vld [vmem:[%s3221_s26 + $0x18] sm:$0xe] }
  0x22   : > { %v646_v11 = vsel %vm3214_vm2, %v2455_v6, %v645_v7  ;;  %v647_v12 = vrot.slane %v645_v7, 4  ;;  %v1175_v17 = vrot.slane %v2531_v13, 5  ;;  %v2533_v19 = vld [vmem:[%s3221_s26 + $0x1c] sm:$0xf]  ;;  %v2534_v23 = vld [vmem:[%s3221_s26 + $0x20] sm:$0x1] }
  0x23   : > { %1343 = vrot.lane.b32.xlu1 %v2908_v2, %s3101_s30  ;;  %v1173_v21 = vsel %vm3214_vm2, %v2553_v14, %v1172_v15  ;;  %v1174_v22 = vrot.slane %v1172_v15, 4  ;;  %v2554_v24 = vrot.slane %v2532_v18, 9  ;;  %v595_v25 = vld [vmem:[%s3221_s26 + $0xc] sm:$0xe]  ;;  %v1179_v27 = vrot.slane %v2533_v19, 5  ;;  %v2927_v3 = vld [vmem:[%s3943_s1 + $0x20] sm:$0xff]  }
  0x24   : > { %v649_v20 = vsel %vm3214_vm2, %v647_v12, %v648_v8  ;;  %v1182_v28 = vrot.slane %v2534_v23, 5  ;;  %v596_v29 = vld [vmem:[%s3221_s26 + $0x10] sm:$0xf]  ;;  %v597_v30 = vld [vmem:[%s3221_s26 + $0x14] sm:$0x1]  ;;  %v2456_v32 = vrot.slane %v595_v25, 9 }
  0x25   : > { %v2463_v26 = vcombine.low %v646_v11, %v649_v20  ;;  %v1176_v31 = vsel %vm3214_vm2, %v1174_v22, %v1175_v17  ;;  %v652_v33 = vrot.slane %v596_v29, 5  ;;  %v655_v34 = vrot.slane %v597_v30, 5  ;;  %v2497_v35 = vld [vmem:[%s3221_s26 + $0xc] sm:$0xf]  ;;  %v2498_v39 = vld [vmem:[%s3221_s26 + $0x10] sm:$0xf] }
  0x26   : > { %v2561_v36 = vcombine.low %v1173_v21, %v1176_v31  ;;  %v1180_v37 = vsel %vm3214_vm2, %v2554_v24, %v1179_v27  ;;  %v1181_v38 = vrot.slane %v1179_v27, 4  ;;  %v2499_v40 = vld [vmem:[%s3221_s26 + $0x14] sm:$0x1]  ;;  %v874_v41 = vshrl.u32 %v2497_v35, 16  ;;  %v316_v46 = vld [vmem:[%s3221_s26] sm:$0xf] }
  0x27   : > { %723 = vrot.lane.b32.xlu0 %v2463_v26, %s3102_s8  ;;  %818 = vrot.lane.b32.xlu1 %v2909_v16, %s3100_s27  ;;  %v653_v42 = vsel %vm3214_vm2, %v2456_v32, %v652_v33  ;;  %v654_v43 = vrot.slane %v652_v33, 4  ;;  %v877_v44 = vshll.u32 %v2497_v35, 16  ;;  %v883_v45 = vshll.u32 %v2498_v39, 16  ;;  %v317_v51 = vld [vmem:[%s3221_s26 + $0x4] sm:$0xf] }
  0x28   : > { %v1183_v47 = vsel %vm3214_vm2, %v1181_v38, %v1182_v28  ;;  %v876_v48 = vrot.slane %v874_v41, 4  ;;  %v887_v49 = vshrl.u32 %v2498_v39, 16  ;;  %v893_v50 = vshll.u32 %v2499_v40, 16  ;;  %v318_v56 = vld [vmem:[%s3221_s26 + $0x8] sm:$0x1] }
  0x29   : > { %v2562_v52 = vcombine.low %v1180_v37, %v1183_v47  ;;  %v656_v53 = vsel %vm3214_vm2, %v654_v43, %v655_v34  ;;  %v879_v54 = vrot.slane %v877_v44, 5  ;;  %v885_v55 = vrot.slane %v883_v45, 5  ;;  %v319_v57 = vld [vmem:[%s3221_s26 + $0xc] sm:$0xf]  ;;  %v320_v7 = vld [vmem:[%s3221_s26 + $0x10] sm:$0xf] }
  0x2a   : > { %v2464_v58 = vcombine.low %v653_v42, %v656_v53  ;;  %v889_v59 = vrot.slane %v887_v49, 4  ;;  %v895_v60 = vrot.slane %v893_v50, 5  ;;  %v344_v61 = vshrl.u32 %v316_v46, 16  ;;  %v321_v13 = vld [vmem:[%s3221_s26 + $0x14] sm:$0x1] }
  0x2b   : > { %1250 = vrot.lane.b32.xlu0 %v2561_v36, %s3103_s9  ;;  %1252 = vrot.lane.b32.xlu1 %v2562_v52, %s3103_s9  ;;  %v880_v62 = vor.u32 %v879_v54, %v876_v48  ;;  %v347_v63 = vshll.u32 %v316_v46, 16  ;;  %v353_v1 = vshll.u32 %v317_v51, 16  ;;  %v357_v2 = vshrl.u32 %v317_v51, 16  ;;  %v2595_v22 = vld [vmem:[%s3221_s26 + $0x18] sm:$0xf] }
  0x2c   : > { %v890_v4 = vor.u32 %v889_v59, %v885_v55  ;;  %v346_v5 = vrot.slane %v344_v61, 4  ;;  %v363_v6 = vshll.u32 %v318_v56, 16  ;;  %v368_v8 = vshrl.u32 %v319_v57, 16  ;;  %v2596_v27 = vld [vmem:[%s3221_s26 + $0x1c] sm:$0xf] }
  0x2d   : > { %v881_v9 = vrot.slane %v880_v62, 4  ;;  %v349_v10 = vrot.slane %v347_v63, 5  ;;  %v355_v11 = vrot.slane %v353_v1, 5  ;;  %v359_v12 = vrot.slane %v357_v2, 4  ;;  %v2597_v35 = vld [vmem:[%s3221_s26 + $0x20] sm:$0x1] }
  0x2e   : > { %v891_v14 = vrot.slane %v890_v4, 4  ;;  %v365_v15 = vrot.slane %v363_v6, 5  ;;  %v370_v16 = vrot.slane %v368_v8, 4  ;;  %v371_v17 = vshll.u32 %v319_v57, 16  ;;  %v2598_v41 = vld [vmem:[%s3221_s26 + $0x24] sm:$0xf] }
  0x2f   : > { %725 = vrot.lane.b32.xlu0 %v2464_v58, %s3102_s8  ;;  %v886_v18 = vsel %vm3269_vm5, %v881_v9, %v885_v55  ;;  %v350_v19 = vor.u32 %v349_v10, %v346_v5  ;;  %v360_v20 = vor.u32 %v359_v12, %v355_v11  ;;  %v377_v21 = vshll.u32 %v320_v7, 16  ;;  %v2599_v46 = vld [vmem:[%s3221_s26 + $0x28] sm:$0xf]  ;;  %v2600_v51 = vld [vmem:[%s3221_s26 + $0x2c] sm:$0x1] }
  0x30   : > { %v896_v23 = vsel %vm3269_vm5, %v891_v14, %v895_v60  ;;  %v373_v24 = vrot.slane %v371_v17, 5  ;;  %v381_v25 = vshrl.u32 %v320_v7, 16  ;;  %v387_v26 = vshll.u32 %v321_v13, 16  ;;  %v2500_v60 = vld [vmem:[%s3221_s26 + $0x18] sm:$0xf] }
  0x31   : > { %v2521_v28 = vcombine.low %v886_v18, %v896_v23  ;;  %v351_v29 = vrot.slane %v350_v19, 4  ;;  %v361_v30 = vrot.slane %v360_v20, 4  ;;  %v379_v31 = vrot.slane %v377_v21, 5  ;;  %v2501_v2 = vld [vmem:[%s3221_s26 + $0x1c] sm:$0xf] }
  0x32   : > { %v374_v32 = vor.u32 %v373_v24, %v370_v16  ;;  %v383_v33 = vrot.slane %v381_v25, 4  ;;  %v389_v34 = vrot.slane %v387_v26, 5  ;;  %v1401_v36 = vshrl.u32 %v2595_v22, 16  ;;  %v2502_v8 = vld [vmem:[%s3221_s26 + $0x20] sm:$0x1] }
  0x33   : > { %1089 = vrot.lane.b32.xlu1 %v2521_v28, %s3104_s10  ;;  %v356_v37 = vsel %vm3269_vm5, %v351_v29, %v355_v11  ;;  %v366_v38 = vsel %vm3269_vm5, %v361_v30, %v365_v15  ;;  %v1404_v39 = vshll.u32 %v2595_v22, 16  ;;  %v1410_v40 = vshll.u32 %v2596_v27, 16  ;;  %v598_v13 = vld [vmem:[%s3221_s26 + $0x18] sm:$0xe]  ;;  %v599_v14 = vld [vmem:[%s3221_s26 + $0x1c] sm:$0xf] }
  0x34   : > { %v2447_v42 = vcombine.low %v356_v37, %v366_v38  ;;  %v375_v43 = vrot.slane %v374_v32, 4  ;;  %v384_v44 = vor.u32 %v383_v33, %v379_v31  ;;  %v1403_v45 = vrot.slane %v1401_v36, 4  ;;  %v600_v19 = vld [vmem:[%s3221_s26 + $0x20] sm:$0x1]  ;;  %v2503_v20 = vld [vmem:[%s3221_s26 + $0x24] sm:$0xf] }
  0x35   : > { %v1406_v47 = vrot.slane %v1404_v39, 5  ;;  %v1412_v48 = vrot.slane %v1410_v40, 5  ;;  %v1414_v49 = vshrl.u32 %v2596_v27, 16  ;;  %v1420_v50 = vshll.u32 %v2597_v35, 16  ;;  %v2504_v37 = vld [vmem:[%s3221_s26 + $0x28] sm:$0xf] }
  0x36   : > { %559 = vrot.lane.b32.xlu0 %v2447_v42, %s3105_s12  ;;  %v380_v52 = vsel %vm3269_vm5, %v375_v43, %v379_v31  ;;  %v385_v53 = vrot.slane %v384_v44, 4  ;;  %v1425_v54 = vshrl.u32 %v2598_v41, 16  ;;  %v1428_v55 = vshll.u32 %v2598_v41, 16  ;;  %v2505_v41 = vld [vmem:[%s3221_s26 + $0x2c] sm:$0x1] }
  0x37   : > { %v1407_v56 = vor.u32 %v1406_v47, %v1403_v45  ;;  %v1416_v57 = vrot.slane %v1414_v49, 4  ;;  %v1422_v58 = vrot.slane %v1420_v50, 5  ;;  %v1434_v59 = vshll.u32 %v2599_v46, 16  ;;  %v322_v47 = vld [vmem:[%s3221_s26 + $0x18] sm:$0xf] }
  0x38   : > { %v390_v61 = vsel %vm3269_vm5, %v385_v53, %v389_v34  ;;  %v1427_v62 = vrot.slane %v1425_v54, 4  ;;  %v1430_v63 = vrot.slane %v1428_v55, 5  ;;  %v1438_v1 = vshrl.u32 %v2599_v46, 16 }
  0x39   : > { %v2448_v4 = vcombine.low %v380_v52, %v390_v61  ;;  %v1408_v5 = vrot.slane %v1407_v56, 4  ;;  %v1417_v6 = vor.u32 %v1416_v57, %v1412_v48  ;;  %v1436_v7 = vrot.slane %v1434_v59, 5  ;;  %v323_v52 = vld [vmem:[%s3221_s26 + $0x1c] sm:$0xf]  ;;  %v324_v57 = vld [vmem:[%s3221_s26 + $0x20] sm:$0x1] }
  0x3a   : > { %v1431_v9 = vor.u32 %v1430_v63, %v1427_v62  ;;  %v1440_v10 = vrot.slane %v1438_v1, 4  ;;  %v1444_v11 = vshll.u32 %v2600_v51, 16  ;;  %v898_v12 = vshrl.u32 %v2500_v60, 16 }
  0x3b   : > { %561 = vrot.lane.b32.xlu1 %v2448_v4, %s3105_s12  ;;  %v1413_v15 = vsel %vm3269_vm5, %v1408_v5, %v1412_v48  ;;  %v1418_v16 = vrot.slane %v1417_v6, 4  ;;  %v901_v17 = vshll.u32 %v2500_v60, 16  ;;  %v907_v18 = vshll.u32 %v2501_v2, 16  ;;  %v325_v4 = vld [vmem:[%s3221_s26 + $0x24] sm:$0xf] }
  0x3c   : > { %v1432_v21 = vrot.slane %v1431_v9, 4  ;;  %v1441_v22 = vor.u32 %v1440_v10, %v1436_v7  ;;  %v1446_v23 = vrot.slane %v1444_v11, 5  ;;  %v900_v24 = vrot.slane %v898_v12, 4  ;;  %v2910_v9 = vld [vmem:[%s3221_s26 + $0x24] sm:$0xff]  }
  0x3d   : > { %v1423_v25 = vsel %vm3269_vm5, %v1418_v16, %v1422_v58  ;;  %v903_v26 = vrot.slane %v901_v17, 5  ;;  %v909_v27 = vrot.slane %v907_v18, 5  ;;  %v911_v28 = vshrl.u32 %v2501_v2, 16  ;;  %v326_v16 = vld [vmem:[%s3221_s26 + $0x28] sm:$0xf] }
  0x3e   : > { %v2619_v29 = vcombine.low %v1413_v15, %v1423_v25  ;;  %v1437_v30 = vsel %vm3269_vm5, %v1432_v21, %v1436_v7  ;;  %v1442_v31 = vrot.slane %v1441_v22, 4  ;;  %v917_v32 = vshll.u32 %v2502_v8, 16 }
  0x3f   : > { %v904_v33 = vor.u32 %v903_v26, %v900_v24  ;;  %v913_v34 = vrot.slane %v911_v28, 4  ;;  %v2457_v35 = vrot.slane %v598_v13, 9  ;;  %v659_v36 = vrot.slane %v599_v14, 5  ;;  %v2535_v28 = vld [vmem:[%s3221_s26 + $0x24] sm:$0xe] }
  0x40   : > { %1616 = vrot.lane.b32.xlu0 %v2619_v29, %s3106_s13  ;;  %v1447_v38 = vsel %vm3269_vm5, %v1442_v31, %v1446_v23  ;;  %v919_v39 = vrot.slane %v917_v32, 5  ;;  %v662_v40 = vrot.slane %v600_v19, 5  ;;  %v922_v42 = vshrl.u32 %v2503_v20, 16  ;;  %v327_v23 = vld [vmem:[%s3221_s26 + $0x2c] sm:$0x1] }
  0x41   : > { %v2620_v43 = vcombine.low %v1437_v30, %v1447_v38  ;;  %v905_v44 = vrot.slane %v904_v33, 4  ;;  %v914_v45 = vor.u32 %v913_v34, %v909_v27  ;;  %v660_v46 = vsel %vm3214_vm2, %v2457_v35, %v659_v36  ;;  %v2536_v33 = vld [vmem:[%s3221_s26 + $0x28] sm:$0xf]  ;;  %v2537_v38 = vld [vmem:[%s3221_s26 + $0x2c] sm:$0x1] }
  0x42   : > { %v661_v48 = vrot.slane %v659_v36, 4  ;;  %v924_v49 = vrot.slane %v922_v42, 4  ;;  %v925_v50 = vshll.u32 %v2503_v20, 16  ;;  %v931_v51 = vshll.u32 %v2504_v37, 16 }
  0x43   : > { %1618 = vrot.lane.b32.xlu1 %v2620_v43, %s3106_s13  ;;  %v910_v53 = vsel %vm3269_vm5, %v905_v44, %v909_v27  ;;  %v915_v54 = vrot.slane %v914_v45, 4  ;;  %v935_v55 = vshrl.u32 %v2504_v37, 16  ;;  %v941_v56 = vshll.u32 %v2505_v41, 16  ;;  %v2602_v44 = vld [vmem:[%s3221_s26 + $0x34] sm:$0xf] }
  0x44   : > { %v663_v58 = vsel %vm3214_vm2, %v661_v48, %v662_v40  ;;  %v927_v59 = vrot.slane %v925_v50, 5  ;;  %v933_v60 = vrot.slane %v931_v51, 5  ;;  %v392_v61 = vshrl.u32 %v322_v47, 16  ;;  %v2603_v50 = vld [vmem:[%s3221_s26 + $0x38] sm:$0x1] }
  0x45   : > { %v920_v62 = vsel %vm3269_vm5, %v915_v54, %v919_v39  ;;  %v2465_v63 = vcombine.low %v660_v46, %v663_v58  ;;  %v937_v1 = vrot.slane %v935_v55, 4  ;;  %v943_v2 = vrot.slane %v941_v56, 5  ;;  %v2601_v39 = vld [vmem:[%s3221_s26 + $0x30] sm:$0xf]  ;;  %v2539_v56 = vld [vmem:[%s3221_s26 + $0x34] sm:$0xf] }
  0x46   : > { %v2522_v5 = vcombine.low %v910_v53, %v920_v62  ;;  %v928_v6 = vor.u32 %v927_v59, %v924_v49  ;;  %v394_v7 = vrot.slane %v392_v61, 4  ;;  %v395_v8 = vshll.u32 %v322_v47, 16  ;;  %v2911_v46 = vld [vmem:[%s3221_s26 + $0x30] sm:$0xff]   ;;  %v2540_v61 = vld [vmem:[%s3221_s26 + $0x38] sm:$0x1] }
  0x47   : > { %727 = vrot.lane.b32.xlu1 %v2465_v63, %s3102_s8  ;;  %v938_v10 = vor.u32 %v937_v1, %v933_v60  ;;  %v401_v11 = vshll.u32 %v323_v52, 16  ;;  %v405_v12 = vshrl.u32 %v323_v52, 16  ;;  %v411_v13 = vshll.u32 %v324_v57, 16  ;;  %v2538_v55 = vld [vmem:[%s3221_s26 + $0x30] sm:$0xe] }
  0x48   : > { %1091 = vrot.lane.b32.xlu0 %v2522_v5, %s3104_s10  ;;  %v929_v14 = vrot.slane %v928_v6, 4  ;;  %v397_v15 = vrot.slane %v395_v8, 5  ;;  %v416_v17 = vshrl.u32 %v325_v4, 16  ;;  %v419_v18 = vshll.u32 %v325_v4, 16  ;;  %v601_v62 = vld [vmem:[%s3221_s26 + $0x24] sm:$0xe] }
  0x49   : > { %v939_v19 = vrot.slane %v938_v10, 4  ;;  %v403_v20 = vrot.slane %v401_v11, 5  ;;  %v407_v21 = vrot.slane %v405_v12, 4  ;;  %v413_v22 = vrot.slane %v411_v13, 5  ;;  %v602_v63 = vld [vmem:[%s3221_s26 + $0x28] sm:$0xf] }
  0x4a   : > { %v934_v24 = vsel %vm3269_vm5, %v929_v14, %v933_v60  ;;  %v398_v25 = vor.u32 %v397_v15, %v394_v7  ;;  %v418_v26 = vrot.slane %v416_v17, 4  ;;  %v421_v27 = vrot.slane %v419_v18, 5  ;;  %v2912_v6 = vld [vmem:[%s3221_s26 + $0x24] sm:$0xff]   ;;  %v603_v15 = vld [vmem:[%s3221_s26 + $0x2c] sm:$0x1] }
  0x4b   : > { %v944_v29 = vsel %vm3269_vm5, %v939_v19, %v943_v2  ;;  %v408_v30 = vor.u32 %v407_v21, %v403_v20  ;;  %v425_v31 = vshll.u32 %v326_v16, 16  ;;  %v429_v32 = vshrl.u32 %v326_v16, 16  ;;  %v2913_v21 = vld [vmem:[%s3221_s26 + $0x30] sm:$0xff]  }
  0x4c   : > { %1345 = vrot.lane.b32.xlu0 %v2910_v9, %s3101_s30  ;;  %v2523_v34 = vcombine.low %v934_v24, %v944_v29  ;;  %v399_v35 = vrot.slane %v398_v25, 4  ;;  %v422_v36 = vor.u32 %v421_v27, %v418_v26  ;;  %v435_v37 = vshll.u32 %v327_v23, 16  ;;  %v2605_v26 = vld [vmem:[%s3221_s26 + $0x40] sm:$0xf] }
  0x4d   : > { %v409_v40 = vrot.slane %v408_v30, 4  ;;  %v427_v41 = vrot.slane %v425_v31, 5  ;;  %v431_v42 = vrot.slane %v429_v32, 4  ;;  %v2555_v43 = vrot.slane %v2535_v28, 9  ;;  %v2606_v31 = vld [vmem:[%s3221_s26 + $0x44] sm:$0x1] }
  0x4e   : > { %1093 = vrot.lane.b32.xlu1 %v2523_v34, %s3104_s10  ;;  %v404_v45 = vsel %vm3269_vm5, %v399_v35, %v403_v20  ;;  %v423_v47 = vrot.slane %v422_v36, 4  ;;  %v437_v48 = vrot.slane %v435_v37, 5  ;;  %v1186_v49 = vrot.slane %v2536_v33, 5  ;;  %v2604_v20 = vld [vmem:[%s3221_s26 + $0x3c] sm:$0xf] }
  0x4f   : > { %v414_v51 = vsel %vm3269_vm5, %v409_v40, %v413_v22  ;;  %v432_v52 = vor.u32 %v431_v42, %v427_v41  ;;  %v1189_v53 = vrot.slane %v2537_v38, 5  ;;  %v1449_v54 = vshrl.u32 %v2601_v39, 16  ;;  %v2506_v32 = vld [vmem:[%s3221_s26 + $0x30] sm:$0xf]  ;;  %v2507_v37 = vld [vmem:[%s3221_s26 + $0x34] sm:$0xf] }
  0x50   : > { %v2449_v57 = vcombine.low %v404_v45, %v414_v51  ;;  %v428_v58 = vsel %vm3269_vm5, %v423_v47, %v427_v41  ;;  %v1187_v59 = vsel %vm3214_vm2, %v2555_v43, %v1186_v49  ;;  %v1188_v60 = vrot.slane %v1186_v49, 4 }
  0x51   : > { %v433_v1 = vrot.slane %v432_v52, 4  ;;  %v1451_v2 = vrot.slane %v1449_v54, 4  ;;  %v1452_v4 = vshll.u32 %v2601_v39, 16  ;;  %v1458_v5 = vshll.u32 %v2602_v44, 16 }
  0x52   : > { %563 = vrot.lane.b32.xlu0 %v2449_v57, %s3105_s12  ;;  %1347 = vrot.lane.b32.xlu1 %v2911_v46, %s3101_s30  ;;  %v1190_v7 = vsel %vm3214_vm2, %v1188_v60, %v1189_v53  ;;  %v1462_v8 = vshrl.u32 %v2602_v44, 16  ;;  %v1468_v9 = vshll.u32 %v2603_v50, 16  ;;  %v2556_v10 = vrot.slane %v2538_v55, 9  ;;  %v2508_v50 = vld [vmem:[%s3221_s26 + $0x38] sm:$0x1] }
  0x53   : > { %v438_v11 = vsel %vm3269_vm5, %v433_v1, %v437_v48  ;;  %v2563_v12 = vcombine.low %v1187_v59, %v1190_v7  ;;  %v1454_v13 = vrot.slane %v1452_v4, 5  ;;  %v1460_v14 = vrot.slane %v1458_v5, 5  ;;  %v604_v55 = vld [vmem:[%s3221_s26 + $0x30] sm:$0xe]  ;;  %v605_v60 = vld [vmem:[%s3221_s26 + $0x34] sm:$0xf] }
  0x54   : > { %v2450_v16 = vcombine.low %v428_v58, %v438_v11  ;;  %v1464_v17 = vrot.slane %v1462_v8, 4  ;;  %v1470_v18 = vrot.slane %v1468_v9, 5  ;;  %v1193_v19 = vrot.slane %v2539_v56, 5  ;;  %v2509_v8 = vld [vmem:[%s3221_s26 + $0x3c] sm:$0xf] }
  0x55   : > { %v1455_v22 = vor.u32 %v1454_v13, %v1451_v2  ;;  %v1196_v23 = vrot.slane %v2540_v61, 5  ;;  %v2458_v24 = vrot.slane %v601_v62, 9  ;;  %v666_v25 = vrot.slane %v602_v63, 5  ;;  %v606_v2 = vld [vmem:[%s3221_s26 + $0x38] sm:$0x1] }
  0x56   : > { %820 = vrot.lane.b32.xlu0 %v2912_v6, %s3100_s27  ;;  %565 = vrot.lane.b32.xlu1 %v2450_v16, %s3105_s12  ;;  %v1465_v27 = vor.u32 %v1464_v17, %v1460_v14  ;;  %v1194_v28 = vsel %vm3214_vm2, %v2556_v10, %v1193_v19  ;;  %v1195_v29 = vrot.slane %v1193_v19, 4  ;;  %v669_v30 = vrot.slane %v603_v15, 5  ;;  %v2510_v13 = vld [vmem:[%s3221_s26 + $0x40] sm:$0xf] }
  0x57   : > { %v1456_v33 = vrot.slane %v1455_v22, 4  ;;  %v667_v34 = vsel %vm3214_vm2, %v2458_v24, %v666_v25  ;;  %v668_v35 = vrot.slane %v666_v25, 4  ;;  %v1473_v36 = vshrl.u32 %v2604_v20, 16 }
  0x58   : > { %v1466_v38 = vrot.slane %v1465_v27, 4  ;;  %v1197_v39 = vsel %vm3214_vm2, %v1195_v29, %v1196_v23  ;;  %v1476_v40 = vshll.u32 %v2604_v20, 16  ;;  %v1482_v41 = vshll.u32 %v2605_v26, 16  ;;  %v328_v27 = vld [vmem:[%s3221_s26 + $0x30] sm:$0xf] }
  0x59   : > { %v1461_v42 = vsel %vm3269_vm5, %v1456_v33, %v1460_v14  ;;  %v2564_v43 = vcombine.low %v1194_v28, %v1197_v39  ;;  %v670_v44 = vsel %vm3214_vm2, %v668_v35, %v669_v30  ;;  %v1475_v45 = vrot.slane %v1473_v36, 4 }
  0x5a   : > { %1254 = vrot.lane.b32.xlu0 %v2563_v12, %s3103_s9  ;;  %822 = vrot.lane.b32.xlu1 %v2913_v21, %s3100_s27  ;;  %v1471_v46 = vsel %vm3269_vm5, %v1466_v38, %v1470_v18  ;;  %v2466_v47 = vcombine.low %v667_v34, %v670_v44  ;;  %v1478_v48 = vrot.slane %v1476_v40, 5  ;;  %v1484_v49 = vrot.slane %v1482_v41, 5  ;;  %v2511_v21 = vld [vmem:[%s3221_s26 + $0x44] sm:$0x1] }
  0x5b   : > { %v2621_v51 = vcombine.low %v1461_v42, %v1471_v46  ;;  %v1486_v52 = vshrl.u32 %v2605_v26, 16  ;;  %v1492_v53 = vshll.u32 %v2606_v31, 16  ;;  %v946_v54 = vshrl.u32 %v2506_v32, 16  ;;  %v2914_v42 = vld [vmem:[%s3221_s26 + $0x3c] sm:$0xff]  }
  0x5c   : > { %v1479_v56 = vor.u32 %v1478_v48, %v1475_v45  ;;  %v949_v57 = vshll.u32 %v2506_v32, 16  ;;  %v955_v58 = vshll.u32 %v2507_v37, 16  ;;  %v959_v59 = vshrl.u32 %v2507_v37, 16  ;;  %v329_v32 = vld [vmem:[%s3221_s26 + $0x34] sm:$0xf] }
  0x5d   : > { %v1488_v61 = vrot.slane %v1486_v52, 4  ;;  %v1494_v62 = vrot.slane %v1492_v53, 5  ;;  %v948_v63 = vrot.slane %v946_v54, 4  ;;  %v965_v1 = vshll.u32 %v2508_v50, 16  ;;  %v330_v37 = vld [vmem:[%s3221_s26 + $0x38] sm:$0x1] }
  0x5e   : > { %1620 = vrot.lane.b32.xlu0 %v2621_v51, %s3106_s13  ;;  %1256 = vrot.lane.b32.xlu1 %v2564_v43, %s3103_s9  ;;  %v1480_v4 = vrot.slane %v1479_v56, 4  ;;  %v951_v5 = vrot.slane %v949_v57, 5  ;;  %v957_v6 = vrot.slane %v955_v58, 5  ;;  %v961_v7 = vrot.slane %v959_v59, 4  ;;  %v331_v51 = vld [vmem:[%s3221_s26 + $0x3c] sm:$0xf] }
  0x5f   : > { %v1489_v9 = vor.u32 %v1488_v61, %v1484_v49  ;;  %v967_v10 = vrot.slane %v965_v1, 5  ;;  %v2459_v11 = vrot.slane %v604_v55, 9  ;;  %v673_v12 = vrot.slane %v605_v60, 5  ;;  %v332_v52 = vld [vmem:[%s3221_s26 + $0x40] sm:$0xf] }
  0x60   : > { %v1485_v14 = vsel %vm3269_vm5, %v1480_v4, %v1484_v49  ;;  %v952_v15 = vor.u32 %v951_v5, %v948_v63  ;;  %v962_v16 = vor.u32 %v961_v7, %v957_v6  ;;  %v676_v17 = vrot.slane %v606_v2, 5  ;;  %v333_v61 = vld [vmem:[%s3221_s26 + $0x44] sm:$0x1]  ;;  %v2541_v4 = vld [vmem:[%s3221_s26 + $0x3c] sm:$0xe] }
  0x61   : > { %v1490_v18 = vrot.slane %v1489_v9, 4  ;;  %v674_v19 = vsel %vm3214_vm2, %v2459_v11, %v673_v12  ;;  %v675_v20 = vrot.slane %v673_v12, 4  ;;  %v970_v22 = vshrl.u32 %v2509_v8, 16  ;;  %v2542_v9 = vld [vmem:[%s3221_s26 + $0x40] sm:$0xf] }
  0x62   : > { %729 = vrot.lane.b32.xlu0 %v2466_v47, %s3102_s8  ;;  %v953_v23 = vrot.slane %v952_v15, 4  ;;  %v963_v24 = vrot.slane %v962_v16, 4  ;;  %v973_v25 = vshll.u32 %v2509_v8, 16  ;;  %v979_v26 = vshll.u32 %v2510_v13, 16  ;;  %v607_v16 = vld [vmem:[%s3221_s26 + $0x3c] sm:$0xe] }
  0x63   : > { %v1495_v28 = vsel %vm3269_vm5, %v1490_v18, %v1494_v62  ;;  %v677_v29 = vsel %vm3214_vm2, %v675_v20, %v676_v17  ;;  %v972_v30 = vrot.slane %v970_v22, 4  ;;  %v983_v31 = vshrl.u32 %v2510_v13, 16  ;;  %v2915_v13 = vld [vmem:[%s3221_s26 + $0x48] sm:$0xff]   ;;  %v608_v17 = vld [vmem:[%s3221_s26 + $0x40] sm:$0xf] }
  0x64   : > { %v2622_v33 = vcombine.low %v1485_v14, %v1495_v28  ;;  %v958_v34 = vsel %vm3269_vm5, %v953_v23, %v957_v6  ;;  %v968_v35 = vsel %vm3269_vm5, %v963_v24, %v967_v10  ;;  %v2467_v36 = vcombine.low %v674_v19, %v677_v29  ;;  %v2543_v10 = vld [vmem:[%s3221_s26 + $0x44] sm:$0x1] }
  0x65   : > { %v2524_v38 = vcombine.low %v958_v34, %v968_v35  ;;  %v975_v39 = vrot.slane %v973_v25, 5  ;;  %v981_v40 = vrot.slane %v979_v26, 5  ;;  %v985_v41 = vrot.slane %v983_v31, 4  ;;  %v609_v18 = vld [vmem:[%s3221_s26 + $0x44] sm:$0x1] }
  0x66   : > { %1622 = vrot.lane.b32.xlu1 %v2622_v33, %s3106_s13  ;;  %v989_v43 = vshll.u32 %v2511_v21, 16  ;;  %v440_v44 = vshrl.u32 %v328_v27, 16  ;;  %v443_v45 = vshll.u32 %v328_v27, 16  ;;  %v449_v46 = vshll.u32 %v329_v32, 16  ;;  %v2607_v31 = vld [vmem:[%s3221_s26 + $0x48] sm:$0xf] }
  0x67   : > { %1095 = vrot.lane.b32.xlu0 %v2524_v38, %s3104_s10  ;;  %v976_v47 = vor.u32 %v975_v39, %v972_v30  ;;  %v986_v48 = vor.u32 %v985_v41, %v981_v40  ;;  %v453_v49 = vshrl.u32 %v329_v32, 16  ;;  %v459_v50 = vshll.u32 %v330_v37, 16  ;;  %v2916_v33 = vld [vmem:[%s3221_s26 + $0x3c] sm:$0xff]   ;;  %v2608_v41 = vld [vmem:[%s3221_s26 + $0x4c] sm:$0xf] }
  0x68   : > { %v991_v53 = vrot.slane %v989_v43, 5  ;;  %v442_v54 = vrot.slane %v440_v44, 4  ;;  %v445_v55 = vrot.slane %v443_v45, 5  ;;  %v451_v56 = vrot.slane %v449_v46, 5  ;;  %v2609_v44 = vld [vmem:[%s3221_s26 + $0x50] sm:$0x1] }
  0x69   : > { %v977_v57 = vrot.slane %v976_v47, 4  ;;  %v987_v58 = vrot.slane %v986_v48, 4  ;;  %v455_v59 = vrot.slane %v453_v49, 4  ;;  %v461_v60 = vrot.slane %v459_v50, 5  ;;  %v334_v47 = vld [vmem:[%s3221_s26 + $0x48] sm:$0xf] }
  0x6a   : > { %731 = vrot.lane.b32.xlu1 %v2467_v36, %s3102_s8  ;;  %v446_v62 = vor.u32 %v445_v55, %v442_v54  ;;  %v464_v63 = vshrl.u32 %v331_v51, 16  ;;  %v467_v1 = vshll.u32 %v331_v51, 16  ;;  %v473_v2 = vshll.u32 %v332_v52, 16 }
  0x6b   : > { %1349 = vrot.lane.b32.xlu0 %v2914_v42, %s3101_s30  ;;  %v982_v5 = vsel %vm3269_vm5, %v977_v57, %v981_v40  ;;  %v992_v6 = vsel %vm3269_vm5, %v987_v58, %v991_v53  ;;  %v456_v7 = vor.u32 %v455_v59, %v451_v56  ;;  %v477_v8 = vshrl.u32 %v332_v52, 16  ;;  %v335_v52 = vld [vmem:[%s3221_s26 + $0x4c] sm:$0xf]  ;;  %v336_v57 = vld [vmem:[%s3221_s26 + $0x50] sm:$0x1] }
  0x6c   : > { %v2525_v11 = vcombine.low %v982_v5, %v992_v6  ;;  %v447_v12 = vrot.slane %v446_v62, 4  ;;  %v466_v14 = vrot.slane %v464_v63, 4  ;;  %v469_v15 = vrot.slane %v467_v1, 5 }
  0x6d   : > { %v457_v19 = vrot.slane %v456_v7, 4  ;;  %v475_v20 = vrot.slane %v473_v2, 5  ;;  %v479_v21 = vrot.slane %v477_v8, 4  ;;  %v483_v22 = vshll.u32 %v333_v61, 16 }
  0x6e   : > { %1097 = vrot.lane.b32.xlu1 %v2525_v11, %s3104_s10  ;;  %v452_v23 = vsel %vm3269_vm5, %v447_v12, %v451_v56  ;;  %v470_v24 = vor.u32 %v469_v15, %v466_v14  ;;  %v2557_v25 = vrot.slane %v2541_v4, 9  ;;  %v1200_v26 = vrot.slane %v2542_v9, 5  ;;  %v2512_v4 = vld [vmem:[%s3221_s26 + $0x48] sm:$0xf] }
  0x6f   : > { %v462_v27 = vsel %vm3269_vm5, %v457_v19, %v461_v60  ;;  %v480_v28 = vor.u32 %v479_v21, %v475_v20  ;;  %v485_v29 = vrot.slane %v483_v22, 5  ;;  %v1203_v30 = vrot.slane %v2543_v10, 5  ;;  %v2917_v15 = vld [vmem:[%s3221_s26 + $0x48] sm:$0xff]  }
  0x70   : > { %v2451_v32 = vcombine.low %v452_v23, %v462_v27  ;;  %v471_v34 = vrot.slane %v470_v24, 4  ;;  %v1201_v35 = vsel %vm3214_vm2, %v2557_v25, %v1200_v26  ;;  %v1202_v36 = vrot.slane %v1200_v26, 4  ;;  %v610_v24 = vld [vmem:[%s3221_s26 + $0x48] sm:$0xe]  ;;  %v611_v25 = vld [vmem:[%s3221_s26 + $0x4c] sm:$0xf] }
  0x71   : > { %v481_v37 = vrot.slane %v480_v28, 4  ;;  %v2460_v38 = vrot.slane %v607_v16, 9  ;;  %v680_v39 = vrot.slane %v608_v17, 5  ;;  %v683_v40 = vrot.slane %v609_v18, 5  ;;  %v2514_v17 = vld [vmem:[%s3221_s26 + $0x50] sm:$0x1] }
  0x72   : > { %567 = vrot.lane.b32.xlu0 %v2451_v32, %s3105_s12  ;;  %1351 = vrot.lane.b32.xlu1 %v2915_v13, %s3101_s30  ;;  %v476_v42 = vsel %vm3269_vm5, %v471_v34, %v475_v20  ;;  %v1204_v43 = vsel %vm3214_vm2, %v1202_v36, %v1203_v30  ;;  %v1497_v45 = vshrl.u32 %v2607_v31, 16  ;;  %v1500_v46 = vshll.u32 %v2607_v31, 16  ;;  %v2513_v13 = vld [vmem:[%s3221_s26 + $0x4c] sm:$0xf]  ;;  %v612_v30 = vld [vmem:[%s3221_s26 + $0x50] sm:$0x1] }
  0x73   : > { %v486_v48 = vsel %vm3269_vm5, %v481_v37, %v485_v29  ;;  %v2565_v49 = vcombine.low %v1201_v35, %v1204_v43  ;;  %v681_v50 = vsel %vm3214_vm2, %v2460_v38, %v680_v39  ;;  %v682_v51 = vrot.slane %v680_v39, 4  ;;  %v2544_v35 = vld [vmem:[%s3221_s26 + $0x48] sm:$0xe] }
  0x74   : > { %v2452_v53 = vcombine.low %v476_v42, %v486_v48  ;;  %v1499_v54 = vrot.slane %v1497_v45, 4  ;;  %v1502_v55 = vrot.slane %v1500_v46, 5  ;;  %v1506_v56 = vshll.u32 %v2608_v41, 16 }
  0x75   : > { %v684_v58 = vsel %vm3214_vm2, %v682_v51, %v683_v40  ;;  %v1510_v59 = vshrl.u32 %v2608_v41, 16  ;;  %v1516_v60 = vshll.u32 %v2609_v44, 16  ;;  %v488_v61 = vshrl.u32 %v334_v47, 16  ;;  %v2545_v40 = vld [vmem:[%s3221_s26 + $0x4c] sm:$0xf] }
  0x76   : > { %824 = vrot.lane.b32.xlu0 %v2916_v33, %s3100_s27  ;;  %569 = vrot.lane.b32.xlu1 %v2452_v53, %s3105_s12  ;;  %v2468_v62 = vcombine.low %v681_v50, %v684_v58  ;;  %v1503_v63 = vor.u32 %v1502_v55, %v1499_v54  ;;  %v1508_v1 = vrot.slane %v1506_v56, 5  ;;  %v491_v2 = vshll.u32 %v334_v47, 16  ;;  %v2515_v54 = vld [vmem:[%s3221_s26 + $0x54] sm:$0xf]  ;;  %v2516_v55 = vld [vmem:[%s3221_s26 + $0x58] sm:$0xf] }
  0x77   : > { %v1512_v5 = vrot.slane %v1510_v59, 4  ;;  %v1518_v6 = vrot.slane %v1516_v60, 5  ;;  %v490_v7 = vrot.slane %v488_v61, 4  ;;  %v497_v8 = vshll.u32 %v335_v52, 16  ;;  %v2517_v60 = vld [vmem:[%s3221_s26 + $0x5c] sm:$0x1] }
  0x78   : > { %v1504_v9 = vrot.slane %v1503_v63, 4  ;;  %v493_v10 = vrot.slane %v491_v2, 5  ;;  %v501_v11 = vshrl.u32 %v335_v52, 16  ;;  %v507_v12 = vshll.u32 %v336_v57, 16  ;;  %v2610_v61 = vld [vmem:[%s3221_s26 + $0x54] sm:$0xf] }
  0x79   : > { %v1513_v14 = vor.u32 %v1512_v5, %v1508_v1  ;;  %v499_v16 = vrot.slane %v497_v8, 5  ;;  %v994_v18 = vshrl.u32 %v2512_v4, 16  ;;  %v997_v19 = vshll.u32 %v2512_v4, 16 }
  0x7a   : > { %1258 = vrot.lane.b32.xlu0 %v2565_v49, %s3103_s9  ;;  %733 = vrot.lane.b32.xlu1 %v2468_v62, %s3102_s8  ;;  %v1509_v20 = vsel %vm3269_vm5, %v1504_v9, %v1508_v1  ;;  %v494_v21 = vor.u32 %v493_v10, %v490_v7  ;;  %v503_v22 = vrot.slane %v501_v11, 4  ;;  %v509_v23 = vrot.slane %v507_v12, 5  ;;  %v2546_v49 = vld [vmem:[%s3221_s26 + $0x50] sm:$0x1]  ;;  %v2611_v12 = vld [vmem:[%s3221_s26 + $0x58] sm:$0xf] }
  0x7b   : > { %v1514_v26 = vrot.slane %v1513_v14, 4  ;;  %v996_v27 = vrot.slane %v994_v18, 4  ;;  %v999_v28 = vrot.slane %v997_v19, 5  ;;  %v1003_v29 = vshll.u32 %v2513_v13, 16  ;;  %v2547_v18 = vld [vmem:[%s3221_s26 + $0x54] sm:$0xe] }
  0x7c   : > { %v495_v31 = vrot.slane %v494_v21, 4  ;;  %v504_v32 = vor.u32 %v503_v22, %v499_v16  ;;  %v1007_v33 = vshrl.u32 %v2513_v13, 16  ;;  %v1013_v34 = vshll.u32 %v2514_v17, 16  ;;  %v2612_v13 = vld [vmem:[%s3221_s26 + $0x5c] sm:$0x1] }
  0x7d   : > { %v1519_v36 = vsel %vm3269_vm5, %v1514_v26, %v1518_v6  ;;  %v1000_v37 = vor.u32 %v999_v28, %v996_v27  ;;  %v1005_v38 = vrot.slane %v1003_v29, 5  ;;  %v2461_v39 = vrot.slane %v610_v24, 9  ;;  %v2548_v19 = vld [vmem:[%s3221_s26 + $0x58] sm:$0xf]  ;;  %v2549_v24 = vld [vmem:[%s3221_s26 + $0x5c] sm:$0x1] }
  0x7e   : > { %v2623_v41 = vcombine.low %v1509_v20, %v1519_v36  ;;  %826 = vrot.lane.b32.xlu1 %v2917_v15, %s3100_s27  ;;  %v500_v42 = vsel %vm3269_vm5, %v495_v31, %v499_v16  ;;  %v505_v43 = vrot.slane %v504_v32, 4  ;;  %v1009_v44 = vrot.slane %v1007_v33, 4  ;;  %v2613_v29 = vld [vmem:[%s3221_s26 + $0x60] sm:$0xf] }
  0x7f   : > { %v1001_v45 = vrot.slane %v1000_v37, 4  ;;  %v1015_v46 = vrot.slane %v1013_v34, 5  ;;  %v687_v47 = vrot.slane %v611_v25, 5  ;;  %v690_v48 = vrot.slane %v612_v30, 5  ;;  %v2918_v30 = vld [vmem:[%s3221_s26 + $0x54] sm:$0xff]  }
  0x80   : > { %1624 = vrot.lane.b32.xlu0 %v2623_v41, %s3106_s13  ;;  %v510_v50 = vsel %vm3269_vm5, %v505_v43, %v509_v23  ;;  %v1010_v51 = vor.u32 %v1009_v44, %v1005_v38  ;;  %v2558_v52 = vrot.slane %v2544_v35, 9  ;;  %v1207_v53 = vrot.slane %v2545_v40, 5  ;;  %v2919_v44 = vld [vmem:[%s3221_s26 + $0x54] sm:$0xff]  }
  0x81   : > { %v2453_v56 = vcombine.low %v500_v42, %v510_v50  ;;  %v1006_v57 = vsel %vm3269_vm5, %v1001_v45, %v1005_v38  ;;  %v688_v58 = vsel %vm3214_vm2, %v2461_v39, %v687_v47  ;;  %v689_v59 = vrot.slane %v687_v47, 4  ;;  %v2614_v39 = vld [vmem:[%s3221_s26 + $0x64] sm:$0xf] }
  0x82   : > { %v1011_v62 = vrot.slane %v1010_v51, 4  ;;  %v1208_v63 = vsel %vm3214_vm2, %v2558_v52, %v1207_v53  ;;  %v1209_v1 = vrot.slane %v1207_v53, 4  ;;  %v1210_v2 = vrot.slane %v2546_v49, 5  ;;  %v2615_v49 = vld [vmem:[%s3221_s26 + $0x68] sm:$0x1] }
  0x83   : > { %v691_v4 = vsel %vm3214_vm2, %v689_v59, %v690_v48  ;;  %v1018_v5 = vshrl.u32 %v2515_v54, 16  ;;  %v1021_v6 = vshll.u32 %v2515_v54, 16  ;;  %v1027_v7 = vshll.u32 %v2516_v55, 16  ;;  %v337_v54 = vld [vmem:[%s3221_s26 + $0x54] sm:$0xf] }
  0x84   : > { %571 = vrot.lane.b32.xlu0 %v2453_v56, %s3105_s12  ;;  %v1016_v8 = vsel %vm3269_vm5, %v1011_v62, %v1015_v46  ;;  %v2469_v9 = vcombine.low %v688_v58, %v691_v4  ;;  %v1211_v10 = vsel %vm3214_vm2, %v1209_v1, %v1210_v2  ;;  %v1031_v11 = vshrl.u32 %v2516_v55, 16  ;;  %v338_v55 = vld [vmem:[%s3221_s26 + $0x58] sm:$0xf] }
  0x85   : > { %v2526_v14 = vcombine.low %v1006_v57, %v1016_v8  ;;  %v2566_v15 = vcombine.low %v1208_v63, %v1211_v10  ;;  %v1020_v16 = vrot.slane %v1018_v5, 4  ;;  %v1023_v17 = vrot.slane %v1021_v6, 5  ;;  %v339_v6 = vld [vmem:[%s3221_s26 + $0x5c] sm:$0x1] }
  0x86   : > { %v1029_v20 = vrot.slane %v1027_v7, 5  ;;  %v1033_v21 = vrot.slane %v1031_v11, 4  ;;  %v1037_v22 = vshll.u32 %v2517_v60, 16  ;;  %v1521_v23 = vshrl.u32 %v2610_v61, 16  ;;  %v613_v7 = vld [vmem:[%s3221_s26 + $0x54] sm:$0xe] }
  0x87   : > { %1099 = vrot.lane.b32.xlu1 %v2526_v14, %s3104_s10  ;;  %v1024_v25 = vor.u32 %v1023_v17, %v1020_v16  ;;  %v1524_v26 = vshll.u32 %v2610_v61, 16  ;;  %v1530_v27 = vshll.u32 %v2611_v12, 16  ;;  %v1534_v28 = vshrl.u32 %v2611_v12, 16  ;;  %v614_v12 = vld [vmem:[%s3221_s26 + $0x58] sm:$0xf] }
  0x88   : > { %735 = vrot.lane.b32.xlu0 %v2469_v9, %s3102_s8  ;;  %v1034_v31 = vor.u32 %v1033_v21, %v1029_v20  ;;  %v1039_v32 = vrot.slane %v1037_v22, 5  ;;  %v1523_v33 = vrot.slane %v1521_v23, 4  ;;  %v1540_v34 = vshll.u32 %v2612_v13, 16  ;;  %v615_v13 = vld [vmem:[%s3221_s26 + $0x5c] sm:$0x1] }
  0x89   : > { %v1025_v35 = vrot.slane %v1024_v25, 4  ;;  %v1526_v36 = vrot.slane %v1524_v26, 5  ;;  %v1532_v37 = vrot.slane %v1530_v27, 5  ;;  %v1536_v38 = vrot.slane %v1534_v28, 4  ;;  %v2518_v27 = vld [vmem:[%s3221_s26 + $0x60] sm:$0xf] }
  0x8a   : > { %v1035_v40 = vrot.slane %v1034_v31, 4  ;;  %v1542_v41 = vrot.slane %v1540_v34, 5  ;;  %v2559_v42 = vrot.slane %v2547_v18, 9  ;;  %v1214_v43 = vrot.slane %v2548_v19, 5  ;;  %v2920_v28 = vld [vmem:[%s3221_s26 + $0x60] sm:$0xff]  }
  0x8b   : > { %1260 = vrot.lane.b32.xlu1 %v2566_v15, %s3103_s9  ;;  %v1030_v45 = vsel %vm3269_vm5, %v1025_v35, %v1029_v20  ;;  %v1527_v46 = vor.u32 %v1526_v36, %v1523_v33  ;;  %v1537_v47 = vor.u32 %v1536_v38, %v1532_v37  ;;  %v1217_v48 = vrot.slane %v2549_v24, 5 }
  0x8c   : > { %828 = vrot.lane.b32.xlu0 %v2918_v30, %s3100_s27  ;;  %v1040_v50 = vsel %vm3269_vm5, %v1035_v40, %v1039_v32  ;;  %v1215_v51 = vsel %vm3214_vm2, %v2559_v42, %v1214_v43  ;;  %v1216_v52 = vrot.slane %v1214_v43, 4  ;;  %v1545_v53 = vshrl.u32 %v2613_v29, 16 }
  0x8d   : > { %v2527_v56 = vcombine.low %v1030_v45, %v1040_v50  ;;  %v1528_v57 = vrot.slane %v1527_v46, 4  ;;  %v1538_v58 = vrot.slane %v1537_v47, 4  ;;  %v1548_v59 = vshll.u32 %v2613_v29, 16  ;;  %v2552_v50 = vld [vmem:[%s3221_s26 + $0x68] sm:$0x1] }
  0x8e   : > { %v1218_v60 = vsel %vm3214_vm2, %v1216_v52, %v1217_v48  ;;  %v1547_v61 = vrot.slane %v1545_v53, 4  ;;  %v1554_v62 = vshll.u32 %v2614_v39, 16  ;;  %v1558_v63 = vshrl.u32 %v2614_v39, 16  ;;  %v2550_v48 = vld [vmem:[%s3221_s26 + $0x60] sm:$0xe] }
  0x8f   : > { %1353 = vrot.lane.b32.xlu1 %v2919_v44, %s3101_s30  ;;  %v1533_v1 = vsel %vm3269_vm5, %v1528_v57, %v1532_v37  ;;  %v1543_v2 = vsel %vm3269_vm5, %v1538_v58, %v1542_v41  ;;  %v2567_v4 = vcombine.low %v1215_v51, %v1218_v60  ;;  %v1550_v5 = vrot.slane %v1548_v59, 5  ;;  %v2519_v37 = vld [vmem:[%s3221_s26 + $0x64] sm:$0xf]  ;;  %v2520_v41 = vld [vmem:[%s3221_s26 + $0x68] sm:$0x1] }
  0x90   : > { %1101 = vrot.lane.b32.xlu0 %v2527_v56, %s3104_s10  ;;  %v2624_v8 = vcombine.low %v1533_v1, %v1543_v2  ;;  %v1556_v9 = vrot.slane %v1554_v62, 5  ;;  %v1560_v10 = vrot.slane %v1558_v63, 4  ;;  %v1564_v11 = vshll.u32 %v2615_v49, 16  ;;  %v2551_v49 = vld [vmem:[%s3221_s26 + $0x64] sm:$0xf] }
  0x91   : > { %v3534_v14 = vpop.permute.xlu1 %816  ;;  %v1551_v15 = vor.u32 %v1550_v5, %v1547_v61  ;;  %v512_v16 = vshrl.u32 %v337_v54, 16  ;;  %v515_v17 = vshll.u32 %v337_v54, 16  ;;  %v521_v18 = vshll.u32 %v338_v55, 16  ;;  %v2922_v51 = vld [vmem:[%s3943_s1] sm:$0xff]   ;;  %v2616_v56 = vld [vmem:[%s3221_s26 + $0x6c] sm:$0xf] }
  0x92   : > { %v1561_v19 = vor.u32 %v1560_v10, %v1556_v9  ;;  %v1566_v20 = vrot.slane %v1564_v11, 5  ;;  %v525_v21 = vshrl.u32 %v338_v55, 16  ;;  %v531_v22 = vshll.u32 %v339_v6, 16  ;;  %v2921_v6 = vld [vmem:[%s3221_s26 + $0x60] sm:$0xff]  }
  0x93   : > { %1626 = vrot.lane.b32.xlu1 %v2624_v8, %s3106_s13  ;;  %v1552_v23 = vrot.slane %v1551_v15, 4  ;;  %v514_v24 = vrot.slane %v512_v16, 4  ;;  %v517_v25 = vrot.slane %v515_v17, 5  ;;  %v523_v26 = vrot.slane %v521_v18, 5  ;;  %v2929_v11 = vld [vmem:[%s3221_s26] sm:$0xff]   ;;  %v2936_v16 = vld [vmem:[%s3221_s26 + $0x30] sm:$0xff]  }
  0x94   : > { %1262 = vrot.lane.b32.xlu0 %v2567_v4, %s3103_s9  ;;  %v1562_v29 = vrot.slane %v1561_v19, 4  ;;  %v527_v30 = vrot.slane %v525_v21, 4  ;;  %v533_v31 = vrot.slane %v531_v22, 5  ;;  %v2462_v32 = vrot.slane %v613_v7, 9  ;;  %v2617_v4 = vld [vmem:[%s3221_s26 + $0x70] sm:$0xf] }
  0x95   : > { %v1557_v33 = vsel %vm3269_vm5, %v1552_v23, %v1556_v9  ;;  %v518_v34 = vor.u32 %v517_v25, %v514_v24  ;;  %v694_v35 = vrot.slane %v614_v12, 5  ;;  %v697_v36 = vrot.slane %v615_v13, 5  ;;  %v3543_v38 = vpop.permute.xlu1 %1343  ;;  %v3578_v9 = vld [vmem:[%s3943_s1 + $0x8] sm:$0xff]   ;;  %v2934_v13 = vld [vmem:[%s3221_s26 + $0x18] sm:$0xff]   ;;  %308 = vst.msk [vmem:[#allocation2] sm:$0xff] %vm307_vm6, %v2929_v11  ;;  %312 = vst.msk [vmem:[#allocation2 + $0x40] sm:$0xff] %vm307_vm6, %v2936_v16 }
  0x96   : > { %v1567_v39 = vsel %vm3269_vm5, %v1562_v29, %v1566_v20  ;;  %v528_v40 = vor.u32 %v527_v30, %v523_v26  ;;  %v1042_v42 = vshrl.u32 %v2518_v27, 16  ;;  %v1045_v43 = vshll.u32 %v2518_v27, 16  ;;  %v2930_v12 = vld [vmem:[%s3221_s26 + $0xc] sm:$0xff]   ;;  %v2935_v15 = vld [vmem:[%s3221_s26 + $0x24] sm:$0xff]   ;;  %v2937_v23 = vld [vmem:[%s3221_s26 + $0x3c] sm:$0xff]   ;;  %310 = vst.msk [vmem:[#allocation2 + $0x20] sm:$0xff] %vm307_vm6, %v2934_v13 }
  0x97   : > { %v2625_v44 = vcombine.low %v1557_v33, %v1567_v39  ;;  %v519_v45 = vrot.slane %v518_v34, 4  ;;  %v3550_v46 = vsel %vm3214_vm2, %v2462_v32, %v694_v35  ;;  %v696_v47 = vrot.slane %v694_v35, 4  ;;  %v2938_v24 = vld [vmem:[%s3221_s26 + $0x48] sm:$0xff]   ;;  %v2939_v30 = vld [vmem:[%s3221_s26 + $0x54] sm:$0xff]   ;;  %309 = vst.msk [vmem:[#allocation2 + $0x10] sm:$0xff] %vm307_vm6, %v2930_v12  ;;  %311 = vst.msk [vmem:[#allocation2 + $0x30] sm:$0xff] %vm307_vm6, %v2935_v15 }
  0x98   : > { %1355 = vrot.lane.b32.xlu0 %v2920_v28, %s3101_s30  ;;  %v529_v52 = vrot.slane %v528_v40, 4  ;;  %v1044_v53 = vrot.slane %v1042_v42, 4  ;;  %v1047_v54 = vrot.slane %v1045_v43, 5  ;;  %v1051_v55 = vshll.u32 %v2519_v37, 16  ;;  %v3607_v40 = vld [vmem:[%s3221_s26 + $0x18] sm:$0xe] }
  0x99   : > { %v3560_v57 = vpop.permute.xlu0 %723  ;;  %v524_v58 = vsel %vm3269_vm5, %v519_v45, %v523_v26  ;;  %v698_v59 = vsel %vm3214_vm2, %v696_v47, %v697_v36  ;;  %v1055_v60 = vshrl.u32 %v2519_v37, 16  ;;  %v1061_v61 = vshll.u32 %v2520_v41, 16  ;;  %v3580_v10 = vpop.permute.xlu1 %818  ;;  %v2618_v26 = vld [vmem:[%s3221_s26 + $0x74] sm:$0x1]  ;;  %v2628_v45 = vld [vmem:[%s3221_s26 + $0x1c] sm:$0xf] }
  0x9a   : > { %v534_v62 = vsel %vm3269_vm5, %v529_v52, %v533_v31  ;;  %v2470_v63 = vcombine.low %v3550_v46, %v698_v59  ;;  %v1048_v1 = vor.u32 %v1047_v54, %v1044_v53  ;;  %v3569_v2 = vrot.slane %v1051_v55, 5  ;;  %v3619_v46 = vld [vmem:[%s3221_s26 + $0x20] sm:$0x1]  ;;  %v2631_v52 = vld [vmem:[%s3221_s26 + $0x28] sm:$0xf]  ;;  %313 = vst.msk [vmem:[#allocation2 + $0x50] sm:$0xff] %vm307_vm6, %v2937_v23 }
  0x9b   : > { %v2454_v5 = vcombine.low %v524_v58, %v534_v62  ;;  %v1057_v7 = vrot.slane %v1055_v60, 4  ;;  %v3573_v8 = vrot.slane %v1061_v61, 5  ;;  %v3107_v18 = vmov 0   ;;  %v3635_v53 = vld [vmem:[%s3221_s26 + $0x2c] sm:$0x1]  ;;  %314 = vst.msk [vmem:[#allocation2 + $0x60] sm:$0xff] %vm307_vm6, %v2938_v24 }
  0x9c   : > { %1628 = vrot.lane.b32.xlu0 %v2625_v44, %s3106_s13  ;;  %v1049_v17 = vrot.slane %v1048_v1, 4  ;;  %1912 = vmatprep.subr.bf16.mxu0 %v3107_v18  ;;  %v2560_v19 = vrot.slane %v2550_v48, 9  ;;  %v1221_v20 = vrot.slane %v2551_v49, 5  ;;  %v1224_v21 = vrot.slane %v2552_v50, 5  ;;  %v3615_v44 = vld [vmem:[%s3943_s1 + $0x10] sm:$0xff]   ;;  %315 = vst.msk [vmem:[#allocation2 + $0x70] sm:$0xff] %vm307_vm6, %v2939_v30 }
  0x9d   : > { %v3589_v22 = vpop.permute.xlu0 %1250  ;;  %573 = vrot.lane.b32.xlu1 %v2454_v5, %s3105_s12  ;;  %v1058_v25 = vor.u32 %v1057_v7, %v3569_v2  ;;  %1913 = vmatpush1.bf16.msra.mxu0 %v2922_v51  ;;  %v1569_v27 = vshrl.u32 %v2616_v56, 16  ;;  %v1572_v28 = vshll.u32 %v2616_v56, 16  ;;  %v1578_v29 = vshll.u32 %v2617_v4, 16  ;;  %v3627_v50 = vpop.permute.xlu1 %1252  ;;  %v2923_v55 = vld [vmem:[%s3221_s26 + $0x6c] sm:$0xff]   ;;  %v2634_v61 = vld [vmem:[%s3221_s26 + $0x34] sm:$0xf] }
  0x9e   : > { %v1054_v31 = vsel %vm3269_vm5, %v1049_v17, %v3569_v2  ;;  %v1222_v32 = vsel %vm3214_vm2, %v2560_v19, %v1221_v20  ;;  %v1223_v33 = vrot.slane %v1221_v20, 4  ;;  %1914 = vmatprep.subr.bf16.mxu0 %v3107_v18  ;;  %v1582_v34 = vshrl.u32 %v2617_v4, 16  ;;  %2807 = vmatprep.subr.bf16.mxu1 %v3107_v18  ;;  %v2633_v60 = vld [vmem:[%s3221_s26 + $0x30] sm:$0xe]  ;;  %v2636_v4 = vld [vmem:[%s3221_s26 + $0x3c] sm:$0xe] }
  0x9f   : > { %v1059_v35 = vrot.slane %v1058_v25, 4  ;;  %v1571_v36 = vrot.slane %v1569_v27, 4  ;;  %v1574_v37 = vrot.slane %v1572_v28, 5  ;;  %v3604_v39 = vrot.slane %v1578_v29, 5  ;;  %2816 = vmatpush1.bf16.msra.mxu1 %v2922_v51  ;;  %v2630_v51 = vld [vmem:[%s3221_s26 + $0x24] sm:$0xe] }
  0xa0   : > { %737 = vrot.lane.b32.xlu0 %v2470_v63, %s3102_s8  ;;  %v1225_v41 = vsel %vm3214_vm2, %v1223_v33, %v1224_v21  ;;  %v1584_v42 = vrot.slane %v1582_v34, 4  ;;  %v1588_v43 = vshll.u32 %v2618_v26, 16  ;;  %2808 = vmatprep.subr.bf16.mxu1 %v3107_v18  ;;  %v2635_v63 = vld [vmem:[%s3221_s26 + $0x38] sm:$0x1]  ;;  %v2651_v2 = vrot.slane %v3607_v40, 9 }
  0xa1   : > { %830 = vrot.lane.b32.xlu1 %v2921_v6, %s3100_s27  ;;  %v1064_v47 = vsel %vm3269_vm5, %v1059_v35, %v3573_v8  ;;  %v2568_v48 = vcombine.low %v1222_v32, %v1225_v41  ;;  %v1575_v49 = vor.u32 %v1574_v37, %v1571_v36  ;;  %1915 = vmatpush1.bf16.msra.mxu0 %v3578_v9  ;;  %v3645_v59 = vpop.permute.xlu0 %725  ;;  %v2926_v6 = vld [vmem:[%s3943_s1 + $0x18] sm:$0xff]   ;;  %v1699_v7 = vrot.slane %v2628_v45, 5  ;;  %v2637_v11 = vld [vmem:[%s3221_s26 + $0x40] sm:$0xf]  ;;  %v2638_v17 = vld [vmem:[%s3221_s26 + $0x44] sm:$0x1] }
  0xa2   : > { %v2528_v54 = vcombine.low %v1054_v31, %v1064_v47  ;;  %v1585_v56 = vor.u32 %v1584_v42, %v3604_v39  ;;  %v1590_v58 = vrot.slane %v1588_v43, 5  ;;  %1916 = vmatprep.subr.bf16.mxu0 %v3107_v18  ;;  %v1702_v8 = vrot.slane %v3619_v46, 5  ;;  %v3673_v25 = vld [vmem:[%s3221_s26 + $0x48] sm:$0xe]  ;;  %v2640_v26 = vld [vmem:[%s3221_s26 + $0x4c] sm:$0xf] }
  0xa3   : > { %v1576_v62 = vrot.slane %v1575_v49, 4  ;;  %2817 = vmatpush1.bf16.msra.mxu1 %v3578_v9  ;;  %v2652_v9 = vrot.slane %v2630_v51, 9  ;;  %v1706_v13 = vrot.slane %v2631_v52, 5  ;;  %v1709_v15 = vrot.slane %v3635_v53, 5  ;;  %v3684_v32 = vld [vmem:[%s3221_s26 + $0x50] sm:$0x1] }
  0xa4   : > { %1103 = vrot.lane.b32.xlu0 %v2528_v54, %s3104_s10  ;;  %v1586_v1 = vrot.slane %v1585_v56, 4  ;;  %2809 = vmatprep.subr.bf16.mxu1 %v3107_v18  ;;  %v2653_v16 = vrot.slane %v2633_v60, 9  ;;  %v1700_v21 = vsel %vm3214_vm2, %v2651_v2, %v1699_v7  ;;  %v1701_v23 = vrot.slane %v1699_v7, 4  ;;  %v2642_v37 = vld [vmem:[%s3221_s26 + $0x54] sm:$0xe]  ;;  %v2928_v56 = vld [vmem:[%s3943_s1 + $0x28] sm:$0xff]  }
  0xa5   : > { %1264 = vrot.lane.b32.xlu1 %v2568_v48, %s3103_s9  ;;  %v1581_v5 = vsel %vm3269_vm5, %v1576_v62, %v3604_v39  ;;  %1917 = vmatpush1.bf16.msra.mxu0 %v3615_v44  ;;  %v1090_v20 = vpop.permute.xlu1 %1089  ;;  %v1713_v24 = vrot.slane %v2634_v61, 5  ;;  %v1707_v28 = vsel %vm3214_vm2, %v2652_v9, %v1706_v13  ;;  %v1708_v29 = vrot.slane %v1706_v13, 4  ;;  %v2643_v39 = vld [vmem:[%s3221_s26 + $0x58] sm:$0xf]  ;;  %v2645_v45 = vld [vmem:[%s3221_s26 + $0x60] sm:$0xe] }
  0xa6   : > { %v1591_v12 = vsel %vm3269_vm5, %v1586_v1, %v1590_v58  ;;  %1918 = vmatprep.subr.bf16.mxu0 %v3107_v18  ;;  %v1716_v30 = vrot.slane %v2635_v63, 5  ;;  %v2654_v31 = vrot.slane %v2636_v4, 9  ;;  %v1703_v33 = vsel %vm3214_vm2, %v1701_v23, %v1702_v8  ;;  %v2646_v49 = vld [vmem:[%s3221_s26 + $0x64] sm:$0xf]  ;;  %v2647_v51 = vld [vmem:[%s3221_s26 + $0x68] sm:$0x1] }
  0xa7   : > { %v2626_v19 = vcombine.low %v1581_v5, %v1591_v12  ;;  %2818 = vmatpush1.bf16.msra.mxu1 %v3615_v44  ;;  %v1714_v34 = vsel %vm3214_vm2, %v2653_v16, %v1713_v24  ;;  %v1715_v35 = vrot.slane %v1713_v24, 4  ;;  %v1720_v36 = vrot.slane %v2637_v11, 5  ;;  %v2644_v44 = vld [vmem:[%s3221_s26 + $0x5c] sm:$0x1]  ;;  %v2649_v1 = vld [vmem:[%s3221_s26 + $0x70] sm:$0xf] }
  0xa8   : > { %1357 = vrot.lane.b32.xlu0 %v2923_v55, %s3101_s30  ;;  %v560_v27 = vpop.permute.xlu0 %559  ;;  %2810 = vmatprep.subr.bf16.mxu1 %v3107_v18  ;;  %v2659_v40 = vcombine.low %v1700_v21, %v1703_v33  ;;  %v1710_v41 = vsel %vm3214_vm2, %v1708_v29, %v1709_v15  ;;  %v1723_v42 = vrot.slane %v2638_v17, 5  ;;  %v2655_v43 = vrot.slane %v3673_v25, 9  ;;  %v2648_v55 = vld [vmem:[%s3221_s26 + $0x6c] sm:$0xe]  ;;  %v2931_v15 = vld [vmem:[%s3943_s1 + $0x30] sm:$0xff]   ;;  %s2712_s27 = sshll.u32 %s3086_s22, 5 }
  0xa9   : > { %1630 = vrot.lane.b32.xlu1 %v2626_v19, %s3106_s13  ;;  %1919 = vmatpush1.bf16.msra.mxu0 %v2926_v6  ;;  %584 = vst.msk [vmem:[#allocation2] sm:$0xff] %vm583_vm7, %v560_v27  ;;  %v2660_v46 = vcombine.low %v1707_v28, %v1710_v41  ;;  %v1717_v47 = vsel %vm3214_vm2, %v1715_v35, %v1716_v30  ;;  %v1722_v48 = vrot.slane %v1720_v36, 4  ;;  %v1727_v53 = vrot.slane %v2640_v26, 5  ;;  %v2932_v28 = vld [vmem:[%s3943_s1 + $0x38] sm:$0xff]   ;;  %s229_s13 = sand.u32 1, %s3074_s19   ;;  %s2340_s8 = sadd.s32 %s2712_s27, %s2711_s14 }
  0xaa   : > { %1920 = vmatprep.subr.bf16.mxu0 %v3107_v18  ;;  %748 = vst.msk [vmem:[#allocation2] sm:$0xff] %vm747_vm8, %v3560_v57  ;;  %v1721_v57 = vsel %vm3214_vm2, %v2654_v31, %v1720_v36  ;;  %v2661_v52 = vcombine.low %v1714_v34, %v1717_v47  ;;  %v2656_v54 = vrot.slane %v2642_v37, 9  ;;  %v1734_v61 = vrot.slane %v2643_v39, 5  ;;  %s2434_s17 = sshll.u32 %s229_s13, 6  ;;  %s2713_s9 = sshll.u32 %s2340_s8, 6 }
  0xab   : > { %841 = vst.msk [vmem:[#allocation2] sm:$0xff] %vm840_vm9, %v3534_v14  ;;  %2819 = vmatpush1.bf16.msra.mxu1 %v2926_v6  ;;  %v1730_v14 = vrot.slane %v3684_v32, 5  ;;  %v1724_v60 = vsel %vm3214_vm2, %v1722_v48, %v1723_v42  ;;  %v1737_v62 = vrot.slane %v2644_v44, 5  ;;  %v2657_v63 = vrot.slane %v2645_v45, 9  ;;  %v2650_v6 = vld [vmem:[%s3221_s26 + $0x74] sm:$0x1]  ;;  %s3880_s21 = scalar_lea.hbm %s3947_s5, %s2713_s9 }
  0xac   : > { %1114 = vst.msk [vmem:[#allocation2] sm:$0xff] %vm1113_vm10, %v1090_v20  ;;  %2811 = vmatprep.subr.bf16.mxu1 %v3107_v18  ;;  %v2662_v2 = vcombine.low %v1721_v57, %v1724_v60  ;;  %v1729_v4 = vrot.slane %v1727_v53, 4  ;;  %v1741_v5 = vrot.slane %v2646_v49, 5  ;;  %v1735_v7 = vsel %vm3214_vm2, %v2656_v54, %v1734_v61  ;;  %s3866_s12 = scalar_lea.vmem [#allocation3], %s2434_s17  ;;  %s3888_s22 = scalar_lea.sflag [#allocation4], %s229_s13 }
  0xad   : > { %1785 = vst.msk [vmem:[#allocation2 + $0x8] sm:$0xff] %vm307_vm6, %v2659_v40  ;;  %1921 = vmatpush1.bf16.msra.mxu0 %v2927_v3  ;;  %v562_v58 = vpop.permute.xlu1 %561  ;;  %1786 = vst.msk [vmem:[#allocation2 + $0x18] sm:$0xff] %vm307_vm6, %v2660_v46  ;;  %v1736_v8 = vrot.slane %v1734_v61, 4  ;;  %v1744_v9 = vrot.slane %v2647_v51, 5  ;;  %v2658_v11 = vrot.slane %v2648_v55, 9  ;;  %v1748_v13 = vrot.slane %v2649_v1, 5 }
  0xae   : > { %1275 = vst.msk [vmem:[#allocation2] sm:$0xff] %vm1274_vm11, %v3589_v22  ;;  %1922 = vmatprep.subr.bf16.mxu0 %v3107_v18  ;;  %v1728_v22 = vsel %vm3214_vm2, %v2655_v43, %v1727_v53  ;;  %v1743_v12 = vrot.slane %v1741_v5, 4  ;;  %v1751_v17 = vrot.slane %v2650_v6, 5  ;;  %s2343_s15 = sshll.u32 %s3866_s12, 4  ;;  %s3108_s17 = smov [#allocation3]   ;;  %s3882_s15 = int_to_ptr.vmem [resolvable:$true] %s2343_s15 }
  0xaf   : > { %585 = vst.msk [vmem:[#allocation2 + $0x10] sm:$0xff] %vm583_vm7, %v562_v58  ;;  %2820 = vmatpush1.bf16.msra.mxu1 %v2927_v3  ;;  %v1749_v23 = vsel %vm3214_vm2, %v2658_v11, %v1748_v13  ;;  %v1750_v24 = vrot.slane %v1748_v13, 4  ;;  %s3004_s16 = scalar_lea.vmem %s3882_s15, 1024  ;;  %s3008_s14 = sshll.u32 %s3108_s17, 4  ;;  %s3009_s14 = int_to_ptr.vmem [resolvable:$false] %s3008_s14 }
  0xb0   : > { %1368 = vst.msk [vmem:[#allocation2] sm:$0xff] %vm1367_vm12, %v3543_v38  ;;  %v1731_v38 = vsel %vm3214_vm2, %v1729_v4, %v1730_v14  ;;  %2812 = vmatprep.subr.bf16.mxu1 %v3107_v18  ;;  %v1745_v21 = vsel %vm3214_vm2, %v1743_v12, %v1744_v9  ;;  %p3005_p13 = scmp.ne.s32.totalorder %s3882_s15, %s3004_s16  ;;  %s3010_s27 = scalar_lea.vmem %s3009_s14, 2048 }
  0xb1   : > { %1787 = vst.msk [vmem:[#allocation2 + $0x28] sm:$0xff] %vm307_vm6, %v2661_v52  ;;  %1788 = vst.msk [vmem:[#allocation2 + $0x38] sm:$0xff] %vm307_vm6, %v2662_v2  ;;  %1923 = vmatpush1.bf16.msra.mxu0 %v2928_v56  ;;  %v2663_v16 = vcombine.low %v1728_v22, %v1731_v38  ;;  %v1752_v3 = vsel %vm3214_vm2, %v1750_v24, %v1751_v17  ;;  %p3011_p2 = scmp.lt.s32.totalorder %s3882_s15, %s3009_s14  ;;  %p3012_p4 = scmp.lt.s32.totalorder %s3010_s27, %s3004_s16 }
  0xb2   : > { %749 = vst.msk [vmem:[#allocation2 + $0x10] sm:$0xff] %vm747_vm8, %v3645_v59  ;;  %v1742_v59 = vsel %vm3214_vm2, %v2657_v63, %v1741_v5  ;;  %1924 = vmatprep.subr.bf16.mxu0 %v3107_v18  ;;  %v1617_v19 = vpop.permute.xlu0 %1616  ;;  %v2666_v29 = vcombine.low %v1749_v23, %v1752_v3  ;;  %v2113_v3 = vld [vmem:[%s3945_s3] sm:$0xf]  ;;  %p3006_p0 = pnand %p3005_p13, %p3191_p3 }
  0xb3   : > { %842 = vst.msk [vmem:[#allocation2 + $0x10] sm:$0xff] %vm840_vm9, %v3580_v10  ;;  %v1738_v10 = vsel %vm3214_vm2, %v1736_v8, %v1737_v62  ;;  %2821 = vmatpush1.bf16.msra.mxu1 %v2928_v56  ;;  %v2665_v26 = vcombine.low %v1742_v59, %v1745_v21  ;;  %p3013_p5 = por %p3012_p4, %p3011_p2 }
  0xb4   : > { %v2664_v20 = vcombine.low %v1735_v7, %v1738_v10  ;;  %1641 = vst.msk [vmem:[#allocation2] sm:$0xff] %vm1640_vm13, %v1617_v19  ;;  %v1794_v25 = vld [vmem:[#allocation2 + $0x8] sm:$0xff]  ;;  %2813 = vmatprep.subr.bf16.mxu1 %v3107_v18  ;;  %v1796_v35 = vld [vmem:[#allocation2 + $0x18] sm:$0xff]  ;;  %p3007_p1 = pneg %p3006_p0 }
  0xb5   : > { %1789 = vst.msk [vmem:[#allocation2 + $0x48] sm:$0xff] %vm307_vm6, %v2663_v16  ;;  %2677 = vmatprep.mubr.msk.bf16.mxu0 %vm307_vm6, %v1794_v25  ;;  %1925 = vmatpush1.bf16.msra.mxu0 %v2931_v15  ;;  %v1619_v27 = vpop.permute.xlu1 %1618  ;;  %1791 = vst.msk [vmem:[#allocation2 + $0x68] sm:$0xff] %vm307_vm6, %v2665_v26 }
  0xb6   : > { %1790 = vst.msk [vmem:[#allocation2 + $0x58] sm:$0xff] %vm307_vm6, %v2664_v20  ;;  %1926 = vmatprep.subr.bf16.mxu0 %v3107_v18  ;;  %1792 = vst.msk [vmem:[#allocation2 + $0x78] sm:$0xff] %vm307_vm6, %v2666_v29  ;;  %p3014_p6 = pnand %p3013_p5, %p3007_p1 }
  0xb7   : > { %2822 = vmatpush1.bf16.msra.mxu1 %v2931_v15 }
  0xb8   : > { %2814 = vmatprep.subr.bf16.mxu1 %v3107_v18  ;;  %v1800_v47 = vld [vmem:[#allocation2 + $0x38] sm:$0xff] }
  0xb9   : > { %1927 = vmatpush1.bf16.msra.mxu0 %v2932_v28  ;;  %v728_v31 = vpop.permute.xlu1 %727 }
  0xba   : > { %v1092_v30 = vpop.permute.xlu0 %1091  ;;  %1928 = vmatprep.subr.bf16.mxu0 %v3107_v18 }
  0xbb   : > { %1115 = vst.msk [vmem:[#allocation2 + $0x10] sm:$0xff] %vm1113_vm10, %v1092_v30  ;;  %2823 = vmatpush1.bf16.msra.mxu1 %v2932_v28  ;;  %v1793_v33 = vld [vmem:[#allocation2] sm:$0xff] }
  0xbc   : > { %1276 = vst.msk [vmem:[#allocation2 + $0x10] sm:$0xff] %vm1274_vm11, %v3627_v50  ;;  %2815 = vmatprep.subr.bf16.mxu1 %v3107_v18  ;;  %v1806_v32 = vld [vmem:[#allocation2 + $0x68] sm:$0xff]  ;;  %v3834_v28 = vld [vmem:[%s3944_s2] ss:$0 sm:$0xff] }
  0xbd   : > { %1929 = vmatpush1.bf16.msra.mxu0 %v2933_v0  ;;  %2683 = vmatprep.mubr.msk.bf16.mxu1 %vm307_vm6, %v1806_v32  ;;  %v1798_v18 = vld [vmem:[#allocation2 + $0x28] sm:$0xff]  ;;  %v1804_v4 = vld [vmem:[#allocation2 + $0x58] sm:$0xff] }
  0xbe   : > { %v1346_v34 = vpop.permute.xlu0 %1345  ;;  %v1802_v55 = vld [vmem:[#allocation2 + $0x48] sm:$0xff]  ;;  %v1808_v19 = vld [vmem:[#allocation2 + $0x78] sm:$0xff] }
  0xbf   : > { %1369 = vst.msk [vmem:[#allocation2 + $0x10] sm:$0xff] %vm1367_vm12, %v1346_v34  ;;  %2824 = vmatpush1.bf16.msra.mxu1 %v2933_v0 }
  0xc0   : > { %1642 = vst.msk [vmem:[#allocation2 + $0x10] sm:$0xff] %vm1640_vm13, %v1619_v27  ;;  %v1094_v36 = vpop.permute.xlu1 %1093  ;;  %1945 = vmatmul.mubr.bf16.vlgmr.msra.gmra.mrb[0].mxu0 %v1793_v33  ;;  %2825 = vmatprep.subr.msk.bf16.mxu1 %vm2146_vm14, %v2113_v3  ;;  %v2148_v27 = vsel %vm2146_vm14, %v2113_v3, 0 }
  0xc1   : > { %2678 = vmatprep.mubr.msk.bf16.mxu0 %vm307_vm6, %v1796_v35 }
  0xc4   : > { %v564_v37 = vpop.permute.xlu0 %563  ;;  %v1348_v50 = vpop.permute.xlu1 %1347 }
  0xc5   : > { %586 = vst.msk [vmem:[#allocation2 + $0x20] sm:$0xff] %vm583_vm7, %v564_v37 }
  0xc6   : > { %750 = vst.msk [vmem:[#allocation2 + $0x20] sm:$0xff] %vm747_vm8, %v728_v31 }
  0xc7   : > { %v1795_v39 = vld [vmem:[#allocation2 + $0x10] sm:$0xff] }
  0xc8   : > { %v821_v40 = vpop.permute.xlu0 %820  ;;  %v566_v41 = vpop.permute.xlu1 %565  ;;  %1953 = vmatmul.mubr.bf16.gmra.mrb[4].mxu0 %v1795_v39 }
  0xc9   : > { %843 = vst.msk [vmem:[#allocation2 + $0x20] sm:$0xff] %vm840_vm9, %v821_v40  ;;  %2679 = vmatprep.mubr.msk.bf16.mxu0 %vm307_vm6, %v1798_v18 }
  0xca   : > { %587 = vst.msk [vmem:[#allocation2 + $0x30] sm:$0xff] %vm583_vm7, %v566_v41 }
  0xcb   : > { %1116 = vst.msk [vmem:[#allocation2 + $0x20] sm:$0xff] %vm1113_vm10, %v1094_v36 }
  0xcc   : > { %v1255_v42 = vpop.permute.xlu0 %1254  ;;  %v823_v43 = vpop.permute.xlu1 %822 }
  0xcd   : > { %1277 = vst.msk [vmem:[#allocation2 + $0x20] sm:$0xff] %vm1274_vm11, %v1255_v42 }
  0xce   : > { %1370 = vst.msk [vmem:[#allocation2 + $0x20] sm:$0xff] %vm1367_vm12, %v1348_v50 }
  0xd0   : > { %v1621_v44 = vpop.permute.xlu0 %1620  ;;  %v1257_v45 = vpop.permute.xlu1 %1256 }
  0xd1   : > { %1643 = vst.msk [vmem:[#allocation2 + $0x20] sm:$0xff] %vm1640_vm13, %v1621_v44 }
  0xd4   : > { %v730_v46 = vpop.permute.xlu0 %729 }
  0xd5   : > { %751 = vst.msk [vmem:[#allocation2 + $0x30] sm:$0xff] %vm747_vm8, %v730_v46 }
  0xd6   : > { %844 = vst.msk [vmem:[#allocation2 + $0x30] sm:$0xff] %vm840_vm9, %v823_v43 }
  0xd8   : > { %v1623_v57 = vpop.permute.xlu1 %1622  ;;  %v1797_v48 = vld [vmem:[#allocation2 + $0x20] sm:$0xff] }
  0xd9   : > { %v1096_v49 = vpop.permute.xlu0 %1095  ;;  %1961 = vmatmul.mubr.bf16.gmra.mrb[8].mxu0 %v1797_v48 }
  0xda   : > { %1117 = vst.msk [vmem:[#allocation2 + $0x30] sm:$0xff] %vm1113_vm10, %v1096_v49  ;;  %2680 = vmatprep.mubr.msk.bf16.mxu0 %vm307_vm6, %v1800_v47 }
  0xdb   : > { %1278 = vst.msk [vmem:[#allocation2 + $0x30] sm:$0xff] %vm1274_vm11, %v1257_v45 }
  0xdc   : > { %v732_v51 = vpop.permute.xlu1 %731 }
  0xdd   : > { %v1350_v52 = vpop.permute.xlu0 %1349 }
  0xde   : > { %1371 = vst.msk [vmem:[#allocation2 + $0x30] sm:$0xff] %vm1367_vm12, %v1350_v52 }
  0xdf   : > { %1644 = vst.msk [vmem:[#allocation2 + $0x30] sm:$0xff] %vm1640_vm13, %v1623_v57 }
  0xe0   : > { %v1098_v53 = vpop.permute.xlu1 %1097 }
  0xe4   : > { %v568_v14 = vpop.permute.xlu0 %567  ;;  %v1352_v54 = vpop.permute.xlu1 %1351 }
  0xe5   : > { %588 = vst.msk [vmem:[#allocation2 + $0x40] sm:$0xff] %vm583_vm7, %v568_v14 }
  0xe6   : > { %752 = vst.msk [vmem:[#allocation2 + $0x40] sm:$0xff] %vm747_vm8, %v732_v51  ;;  %v1799_v56 = vld [vmem:[#allocation2 + $0x30] sm:$0xff] }
  0xe7   : > { %1969 = vmatmul.mubr.bf16.gmra.mrb[12].mxu0 %v1799_v56 }
  0xe8   : > { %v825_v58 = vpop.permute.xlu0 %824  ;;  %v570_v60 = vpop.permute.xlu1 %569  ;;  %2681 = vmatprep.mubr.msk.bf16.mxu0 %vm307_vm6, %v1802_v55 }
  0xe9   : > { %845 = vst.msk [vmem:[#allocation2 + $0x40] sm:$0xff] %vm840_vm9, %v825_v58 }
  0xea   : > { %589 = vst.msk [vmem:[#allocation2 + $0x50] sm:$0xff] %vm583_vm7, %v570_v60 }
  0xeb   : > { %1118 = vst.msk [vmem:[#allocation2 + $0x40] sm:$0xff] %vm1113_vm10, %v1098_v53 }
  0xec   : > { %v1259_v61 = vpop.permute.xlu0 %1258  ;;  %v734_v62 = vpop.permute.xlu1 %733 }
  0xed   : > { %1279 = vst.msk [vmem:[#allocation2 + $0x40] sm:$0xff] %vm1274_vm11, %v1259_v61 }
  0xee   : > { %753 = vst.msk [vmem:[#allocation2 + $0x50] sm:$0xff] %vm747_vm8, %v734_v62 }
  0xef   : > { %1372 = vst.msk [vmem:[#allocation2 + $0x40] sm:$0xff] %vm1367_vm12, %v1352_v54 }
  0xf0   : > { %v827_v63 = vpop.permute.xlu1 %826 }
  0xf1   : > { %846 = vst.msk [vmem:[#allocation2 + $0x50] sm:$0xff] %vm840_vm9, %v827_v63 }
  0xf2   : > { %v1625_v1 = vpop.permute.xlu0 %1624 }
  0xf3   : > { %1645 = vst.msk [vmem:[#allocation2 + $0x40] sm:$0xff] %vm1640_vm13, %v1625_v1 }
  0xf6   : > { %v572_v2 = vpop.permute.xlu0 %571 }
  0xf7   : > { %590 = vst.msk [vmem:[#allocation2 + $0x60] sm:$0xff] %vm583_vm7, %v572_v2 }
  0xf9   : > { %v1100_v22 = vpop.permute.xlu1 %1099 }
  0xfa   : > { %1119 = vst.msk [vmem:[#allocation2 + $0x50] sm:$0xff] %vm1113_vm10, %v1100_v22  ;;  %v736_v5 = vpop.permute.xlu0 %735  ;;  %v1801_v6 = vld [vmem:[#allocation2 + $0x40] sm:$0xff] }
  0xfb   : > { %754 = vst.msk [vmem:[#allocation2 + $0x60] sm:$0xff] %vm747_vm8, %v736_v5  ;;  %1977 = vmatmul.mubr.bf16.gmra.mrb[16].mxu0 %v1801_v6 }
  0xfc   : > { %2682 = vmatprep.mubr.msk.bf16.mxu0 %vm307_vm6, %v1804_v4 }
  0xfd   : > { %v1261_v7 = vpop.permute.xlu1 %1260 }
  0xfe   : > { %1280 = vst.msk [vmem:[#allocation2 + $0x50] sm:$0xff] %vm1274_vm11, %v1261_v7  ;;  %v829_v8 = vpop.permute.xlu0 %828 }
  0xff   : > { %847 = vst.msk [vmem:[#allocation2 + $0x60] sm:$0xff] %vm840_vm9, %v829_v8 }
 0x101   : > { %v1354_v9 = vpop.permute.xlu1 %1353 }
 0x102   : > { %1373 = vst.msk [vmem:[#allocation2 + $0x50] sm:$0xff] %vm1367_vm12, %v1354_v9  ;;  %v1102_v11 = vpop.permute.xlu0 %1101 }
 0x103   : > { %1120 = vst.msk [vmem:[#allocation2 + $0x60] sm:$0xff] %vm1113_vm10, %v1102_v11 }
 0x105   : > { %v1627_v38 = vpop.permute.xlu1 %1626 }
 0x106   : > { %1646 = vst.msk [vmem:[#allocation2 + $0x50] sm:$0xff] %vm1640_vm13, %v1627_v38  ;;  %v1263_v59 = vpop.permute.xlu0 %1262 }
 0x107   : > { %1281 = vst.msk [vmem:[#allocation2 + $0x60] sm:$0xff] %vm1274_vm11, %v1263_v59 }
 0x10a   : > { %v1356_v12 = vpop.permute.xlu0 %1355 }
 0x10b   : > { %1374 = vst.msk [vmem:[#allocation2 + $0x60] sm:$0xff] %vm1367_vm12, %v1356_v12 }
 0x10d   : > { %v1803_v13 = vld [vmem:[#allocation2 + $0x50] sm:$0xff] }
 0x10e   : > { %v1629_v15 = vpop.permute.xlu0 %1628  ;;  %1985 = vmatmul.mubr.bf16.gmra.mrb[20].mxu0 %v1803_v13 }
 0x10f   : > { %1647 = vst.msk [vmem:[#allocation2 + $0x60] sm:$0xff] %vm1640_vm13, %v1629_v15  ;;  %v574_v16 = vpop.permute.xlu1 %573 }
 0x110   : > { %591 = vst.msk [vmem:[#allocation2 + $0x70] sm:$0xff] %vm583_vm7, %v574_v16 }
 0x112   : > { %v738_v10 = vpop.permute.xlu0 %737 }
 0x113   : > { %755 = vst.msk [vmem:[#allocation2 + $0x70] sm:$0xff] %vm747_vm8, %v738_v10  ;;  %v831_v17 = vpop.permute.xlu1 %830 }
 0x114   : > { %848 = vst.msk [vmem:[#allocation2 + $0x70] sm:$0xff] %vm840_vm9, %v831_v17 }
 0x116   : > { %v1104_v20 = vpop.permute.xlu0 %1103  ;;  %v1805_v21 = vld [vmem:[#allocation2 + $0x60] sm:$0xff] }
 0x117   : > { %1121 = vst.msk [vmem:[#allocation2 + $0x70] sm:$0xff] %vm1113_vm10, %v1104_v20  ;;  %v1265_v23 = vpop.permute.xlu1 %1264  ;;  %1993 = vmatmul.mubr.bf16.vlgmr.msra.gmra.mrb[0].mxu1 %v1805_v21 }
 0x118   : > { %1282 = vst.msk [vmem:[#allocation2 + $0x70] sm:$0xff] %vm1274_vm11, %v1265_v23  ;;  %2684 = vmatprep.mubr.msk.bf16.mxu1 %vm307_vm6, %v1808_v19  ;;  %2790 = vmatpush3.bf16.msra.mxu1 %v2148_v27 }
 0x11a   : > { %v1358_v24 = vpop.permute.xlu0 %1357 }
 0x11b   : > { %1375 = vst.msk [vmem:[#allocation2 + $0x70] sm:$0xff] %vm1367_vm12, %v1358_v24  ;;  %v1631_v25 = vpop.permute.xlu1 %1630 }
 0x11c   : > { %1648 = vst.msk [vmem:[#allocation2 + $0x70] sm:$0xff] %vm1640_vm13, %v1631_v25 }
 0x123   : > { %v1807_v26 = vld [vmem:[#allocation2 + $0x70] sm:$0xff] }
 0x124   : > { %2001 = vmatmul.mubr.bf16.gmra.mrb[4].mxu1 %v1807_v26 }
 0x193   : > { %v1946_v29 = vpop.f32.mrb[0].mxu0 }
 0x194   : > { %v1947_v0 = vadd.f32 %v3834_v28, %v1946_v29  ;;  %v1948_v30 = vpop.f32.mrb[1].mxu0 }
 0x195   : > { %v1949_v31 = vpop.f32.mrb[2].mxu0 }
 0x196   : > { %v2009_v32 = vsub.f32 0.0, %v1947_v0  ;;  %v1950_v33 = vadd.f32 %v3834_v28, %v1949_v31  ;;  %v1951_v34 = vpop.f32.mrb[3].mxu0 }
 0x198   : > { %v2025_v35 = vmul.f32 1.442695, %v2009_v32  ;;  %v2010_v36 = vsub.f32 0.0, %v1950_v33 }
 0x19a   : > { %2940 = vpow2.f32 %v2025_v35  ;;  %v2027_v37 = vmul.f32 1.442695, %v2010_v36 }
 0x19b   : > { %v1954_v50 = vpop.f32.mrb[4].mxu0 }
 0x19c   : > { %2942 = vpow2.f32 %v2027_v37  ;;  %v1955_v18 = vadd.f32 %v3834_v28, %v1954_v50  ;;  %v1956_v39 = vpop.f32.mrb[5].mxu0 }
 0x19d   : > { %v1957_v40 = vpop.f32.mrb[6].mxu0 }
 0x19e   : > { %v2011_v41 = vsub.f32 0.0, %v1955_v18  ;;  %v1958_v42 = vadd.f32 %v3834_v28, %v1957_v40  ;;  %v1959_v43 = vpop.f32.mrb[7].mxu0 }
 0x1a0   : > { %v2029_v44 = vmul.f32 1.442695, %v2011_v41  ;;  %v2012_v45 = vsub.f32 0.0, %v1958_v42 }
 0x1a2   : > { %2944 = vpow2.f32 %v2029_v44  ;;  %v2031_v46 = vmul.f32 1.442695, %v2012_v45 }
 0x1a4   : > { %v2941_v47 = vpop.eup %2940  ;;  %2946 = vpow2.f32 %v2031_v46 }
 0x1a5   : > { %v2057_v57 = vadd.f32 1.0, %v2941_v47 }
 0x1a6   : > { %v2943_v48 = vpop.eup %2942 }
 0x1a7   : > { %2948 = vrcp.f32 %v2057_v57  ;;  %v2058_v49 = vadd.f32 1.0, %v2943_v48 }
 0x1a9   : > { %2950 = vrcp.f32 %v2058_v49 }
 0x1ac   : > { %v2945_v51 = vpop.eup %2944  ;;  %v1962_v52 = vpop.f32.mrb[8].mxu0 }
 0x1ad   : > { %v2059_v53 = vadd.f32 1.0, %v2945_v51  ;;  %v1963_v14 = vadd.f32 %v3834_v28, %v1962_v52  ;;  %v1964_v54 = vpop.f32.mrb[9].mxu0 }
 0x1ae   : > { %v2947_v55 = vpop.eup %2946  ;;  %v1965_v56 = vpop.f32.mrb[10].mxu0 }
 0x1af   : > { %2952 = vrcp.f32 %v2059_v53  ;;  %v2060_v58 = vadd.f32 1.0, %v2947_v55  ;;  %v2013_v60 = vsub.f32 0.0, %v1963_v14  ;;  %v1966_v61 = vadd.f32 %v3834_v28, %v1965_v56  ;;  %v1967_v62 = vpop.f32.mrb[11].mxu0 }
 0x1b1   : > { %v2949_v63 = vpop.eup %2948  ;;  %2954 = vrcp.f32 %v2060_v58  ;;  %v2033_v1 = vmul.f32 1.442695, %v2013_v60  ;;  %v2014_v2 = vsub.f32 0.0, %v1966_v61 }
 0x1b2   : > { %v2089_v5 = vmul.f32 %v2949_v63, %v1947_v0 }
 0x1b3   : > { %v2951_v22 = vpop.eup %2950  ;;  %2956 = vpow2.f32 %v2033_v1  ;;  %v2035_v4 = vmul.f32 1.442695, %v2014_v2 }
 0x1b4   : > { %v2090_v6 = vmul.f32 %v2951_v22, %v1950_v33 }
 0x1b5   : > { %2958 = vpow2.f32 %v2035_v4 }
 0x1b6   : > { %v2105_v7 = vpack.c.bf16 %v2090_v6, %v2089_v5 }
 0x1b8   : > { %2791 = vmatprep.mubr.msk.bf16.mxu1 %vm2121_vm15, %v2105_v7 }
 0x1b9   : > { %v2953_v8 = vpop.eup %2952 }
 0x1ba   : > { %v1970_v9 = vpop.f32.mrb[12].mxu0  ;;  %v2091_v12 = vmul.f32 %v2953_v8, %v1955_v18 }
 0x1bb   : > { %v2955_v11 = vpop.eup %2954  ;;  %v1971_v38 = vadd.f32 %v3834_v28, %v1970_v9  ;;  %v1972_v59 = vpop.f32.mrb[13].mxu0 }
 0x1bc   : > { %v2092_v13 = vmul.f32 %v2955_v11, %v1958_v42  ;;  %v1973_v15 = vpop.f32.mrb[14].mxu0 }
 0x1bd   : > { %v2957_v16 = vpop.eup %2956  ;;  %v2015_v10 = vsub.f32 0.0, %v1971_v38  ;;  %v1974_v17 = vadd.f32 %v3834_v28, %v1973_v15  ;;  %v1975_v19 = vpop.f32.mrb[15].mxu0 }
 0x1be   : > { %v2106_v20 = vpack.c.bf16 %v2092_v13, %v2091_v12  ;;  %v2061_v21 = vadd.f32 1.0, %v2957_v16 }
 0x1bf   : > { %v2959_v23 = vpop.eup %2958  ;;  %v2037_v24 = vmul.f32 1.442695, %v2015_v10  ;;  %v2016_v25 = vsub.f32 0.0, %v1974_v17 }
 0x1c0   : > { %2960 = vrcp.f32 %v2061_v21  ;;  %v2062_v26 = vadd.f32 1.0, %v2959_v23  ;;  %2792 = vmatmul.mubr.msk.bf16.vlgmr.msra.gmra.mrb[8].mxu1 %vm2121_vm15, %v2106_v20 }
 0x1c1   : > { %2962 = vpow2.f32 %v2037_v24  ;;  %v2039_v3 = vmul.f32 1.442695, %v2016_v25 }
 0x1c2   : > { %2964 = vrcp.f32 %v2062_v26 }
 0x1c3   : > { %2966 = vpow2.f32 %v2039_v3 }
 0x1ca   : > { %v2961_v27 = vpop.eup %2960 }
 0x1cb   : > { %v2963_v29 = vpop.eup %2962  ;;  %v2093_v32 = vmul.f32 %v2961_v27, %v1963_v14 }
 0x1cc   : > { %v2965_v0 = vpop.eup %2964  ;;  %v2063_v30 = vadd.f32 1.0, %v2963_v29 }
 0x1cd   : > { %v2967_v31 = vpop.eup %2966  ;;  %v2094_v33 = vmul.f32 %v2965_v0, %v1966_v61 }
 0x1ce   : > { %2968 = vrcp.f32 %v2063_v30  ;;  %v2064_v34 = vadd.f32 1.0, %v2967_v31  ;;  %v1978_v35 = vpop.f32.mrb[16].mxu0 }
 0x1cf   : > { %v2107_v36 = vpack.c.bf16 %v2094_v33, %v2093_v32  ;;  %v1979_v37 = vadd.f32 %v3834_v28, %v1978_v35  ;;  %v1980_v50 = vpop.f32.mrb[17].mxu0 }
 0x1d0   : > { %2970 = vrcp.f32 %v2064_v34  ;;  %v1981_v18 = vpop.f32.mrb[18].mxu0 }
 0x1d1   : > { %v2017_v39 = vsub.f32 0.0, %v1979_v37  ;;  %v1982_v40 = vadd.f32 %v3834_v28, %v1981_v18  ;;  %v1983_v41 = vpop.f32.mrb[19].mxu0  ;;  %2795 = vmatprep.mubr.msk.bf16.mxu1 %vm2121_vm15, %v2107_v36 }
 0x1d3   : > { %v2041_v42 = vmul.f32 1.442695, %v2017_v39  ;;  %v2018_v43 = vsub.f32 0.0, %v1982_v40 }
 0x1d5   : > { %2972 = vpow2.f32 %v2041_v42  ;;  %v2043_v44 = vmul.f32 1.442695, %v2018_v43 }
 0x1d7   : > { %2974 = vpow2.f32 %v2043_v44 }
 0x1d8   : > { %v2969_v45 = vpop.eup %2968 }
 0x1d9   : > { %v2095_v47 = vmul.f32 %v2969_v45, %v1971_v38 }
 0x1da   : > { %v2971_v46 = vpop.eup %2970 }
 0x1db   : > { %v2096_v57 = vmul.f32 %v2971_v46, %v1974_v17 }
 0x1dd   : > { %v2108_v48 = vpack.c.bf16 %v2096_v57, %v2095_v47 }
 0x1df   : > { %v2973_v49 = vpop.eup %2972  ;;  %2796 = vmatmul.mubr.msk.bf16.gmra.mrb[12].mxu1 %vm2121_vm15, %v2108_v48 }
 0x1e0   : > { %v2065_v51 = vadd.f32 1.0, %v2973_v49 }
 0x1e1   : > { %v2975_v52 = vpop.eup %2974  ;;  %v1986_v53 = vpop.f32.mrb[20].mxu0 }
 0x1e2   : > { %2976 = vrcp.f32 %v2065_v51  ;;  %v2066_v14 = vadd.f32 1.0, %v2975_v52  ;;  %v1987_v54 = vadd.f32 %v3834_v28, %v1986_v53  ;;  %v1988_v55 = vpop.f32.mrb[21].mxu0  ;;  %v2685_v53 = vld [vmem:[%s3946_s4] ss:$0 sm:$0xff] }
 0x1e3   : > { %v1989_v56 = vpop.f32.mrb[22].mxu0 }
 0x1e4   : > { %2978 = vrcp.f32 %v2066_v14  ;;  %v2019_v58 = vsub.f32 0.0, %v1987_v54  ;;  %v1990_v60 = vadd.f32 %v3834_v28, %v1989_v56  ;;  %v1991_v61 = vpop.f32.mrb[23].mxu0 }
 0x1e6   : > { %v2045_v62 = vmul.f32 1.442695, %v2019_v58  ;;  %v2020_v63 = vsub.f32 0.0, %v1990_v60 }
 0x1e8   : > { %2980 = vpow2.f32 %v2045_v62  ;;  %v2047_v1 = vmul.f32 1.442695, %v2020_v63 }
 0x1ea   : > { %2982 = vpow2.f32 %v2047_v1  ;;  %v1994_v2 = vpop.f32.mrb[0].mxu1 }
 0x1eb   : > { %v1995_v22 = vadd.f32 %v3834_v28, %v1994_v2  ;;  %v1996_v4 = vpop.f32.mrb[1].mxu1 }
 0x1ec   : > { %v2977_v5 = vpop.eup %2976  ;;  %v1997_v6 = vpop.f32.mrb[2].mxu1 }
 0x1ed   : > { %v2021_v7 = vsub.f32 0.0, %v1995_v22  ;;  %v1998_v8 = vadd.f32 %v3834_v28, %v1997_v6  ;;  %v1999_v9 = vpop.f32.mrb[3].mxu1  ;;  %v2097_v38 = vmul.f32 %v2977_v5, %v1979_v37 }
 0x1ee   : > { %v2979_v11 = vpop.eup %2978 }
 0x1ef   : > { %v2098_v59 = vmul.f32 %v2979_v11, %v1982_v40  ;;  %v2049_v12 = vmul.f32 1.442695, %v2021_v7  ;;  %v2022_v13 = vsub.f32 0.0, %v1998_v8 }
 0x1f1   : > { %v2109_v15 = vpack.c.bf16 %v2098_v59, %v2097_v38  ;;  %2984 = vpow2.f32 %v2049_v12  ;;  %v2051_v16 = vmul.f32 1.442695, %v2022_v13 }
 0x1f2   : > { %v2981_v10 = vpop.eup %2980 }
 0x1f3   : > { %v2067_v17 = vadd.f32 1.0, %v2981_v10  ;;  %2986 = vpow2.f32 %v2051_v16  ;;  %2799 = vmatprep.mubr.msk.bf16.mxu1 %vm2121_vm15, %v2109_v15 }
 0x1f4   : > { %v2983_v19 = vpop.eup %2982 }
 0x1f5   : > { %2988 = vrcp.f32 %v2067_v17  ;;  %v2068_v20 = vadd.f32 1.0, %v2983_v19 }
 0x1f7   : > { %2990 = vrcp.f32 %v2068_v20  ;;  %v2002_v21 = vpop.f32.mrb[4].mxu1 }
 0x1f8   : > { %v2003_v23 = vadd.f32 %v3834_v28, %v2002_v21  ;;  %v2004_v24 = vpop.f32.mrb[5].mxu1 }
 0x1f9   : > { %v2005_v25 = vpop.f32.mrb[6].mxu1 }
 0x1fa   : > { %v2023_v26 = vsub.f32 0.0, %v2003_v23  ;;  %v2006_v3 = vadd.f32 %v3834_v28, %v2005_v25  ;;  %v2007_v27 = vpop.f32.mrb[7].mxu1 }
 0x1fb   : > { %v2985_v29 = vpop.eup %2984 }
 0x1fc   : > { %v2069_v0 = vadd.f32 1.0, %v2985_v29  ;;  %v2053_v30 = vmul.f32 1.442695, %v2023_v26  ;;  %v2024_v31 = vsub.f32 0.0, %v2006_v3 }
 0x1fd   : > { %v2987_v32 = vpop.eup %2986 }
 0x1fe   : > { %2992 = vrcp.f32 %v2069_v0  ;;  %v2070_v33 = vadd.f32 1.0, %v2987_v32  ;;  %v2055_v34 = vmul.f32 1.442695, %v2024_v31 }
 0x1ff   : > { %v2989_v35 = vpop.eup %2988  ;;  %2994 = vpow2.f32 %v2053_v30 }
 0x200   : > { %2996 = vrcp.f32 %v2070_v33  ;;  %v2099_v37 = vmul.f32 %v2989_v35, %v1987_v54 }
 0x201   : > { %v2991_v36 = vpop.eup %2990  ;;  %2998 = vpow2.f32 %v2055_v34 }
 0x202   : > { %v2100_v50 = vmul.f32 %v2991_v36, %v1990_v60 }
 0x204   : > { %v2110_v18 = vpack.c.bf16 %v2100_v50, %v2099_v37 }
 0x206   : > { %2800 = vmatmul.mubr.msk.bf16.gmra.mrb[16].mxu1 %vm2121_vm15, %v2110_v18 }
 0x208   : > { %v2993_v28 = vpop.eup %2992 }
 0x209   : > { %v2995_v39 = vpop.eup %2994  ;;  %v2101_v43 = vmul.f32 %v2993_v28, %v1995_v22 }
 0x20a   : > { %v2997_v40 = vpop.eup %2996  ;;  %v2071_v41 = vadd.f32 1.0, %v2995_v39 }
 0x20b   : > { %v2999_v42 = vpop.eup %2998  ;;  %v2102_v44 = vmul.f32 %v2997_v40, %v1998_v8 }
 0x20c   : > { %3000 = vrcp.f32 %v2071_v41  ;;  %v2072_v45 = vadd.f32 1.0, %v2999_v42 }
 0x20d   : > { %v2111_v46 = vpack.c.bf16 %v2102_v44, %v2101_v43 }
 0x20e   : > { %3002 = vrcp.f32 %v2072_v45 }
 0x20f   : > { %2803 = vmatprep.mubr.msk.bf16.mxu1 %vm2121_vm15, %v2111_v46 }
 0x216   : > { %v3001_v47 = vpop.eup %3000 }
 0x217   : > { %v2103_v48 = vmul.f32 %v3001_v47, %v2003_v23 }
 0x218   : > { %v3003_v57 = vpop.eup %3002 }
 0x219   : > { %v2104_v49 = vmul.f32 %v3003_v57, %v2006_v3 }
 0x21b   : > { %v2112_v51 = vpack.c.bf16 %v2104_v49, %v2103_v48 }
 0x21d   : > { %2804 = vmatmul.mubr.msk.bf16.gmra.mrb[20].mxu1 %vm2121_vm15, %v2112_v51 }
 0x293   : > { %v2793_v52 = vpop.f32.mrb[8].mxu1 }
 0x294   : > { %v2184_v14 = vpop.f32.mrb[9].mxu1  ;;  %v2193_v55 = vadd.f32 %v2793_v52, %v2685_v53 }
 0x295   : > { %v2794_v54 = vpop.f32.mrb[10].mxu1  ;;  %v2185_v60 = vadd.f32 %v2685_v53, %v2184_v14 }
 0x296   : > { %v2196_v56 = vadd.f32 %v2794_v54, %v2685_v53  ;;  %v2187_v58 = vpop.f32.mrb[11].mxu1 }
 0x297   : > { %v2188_v61 = vadd.f32 %v2685_v53, %v2187_v58 }
 0x298   : > { %v2741_v62 = vpack.c.bf16 %v2196_v56, %v2193_v55 }
 0x299   : > { %v2736_v63 = vpack.c.bf16 %v2188_v61, %v2185_v60 }
 0x29a   : > { %2773 = vst [vmem:[%s3866_s12 + $0x8] sm:$0xff] %v2741_v62  }
 0x29b   : > { %2737 = vst [vmem:[%s3866_s12] sm:$0xff] %v2736_v63  }
 0x2b2   : > { %v2797_v1 = vpop.f32.mrb[12].mxu1 }
 0x2b3   : > { %v2200_v2 = vpop.f32.mrb[13].mxu1  ;;  %v2209_v4 = vadd.f32 %v2797_v1, %v2685_v53 }
 0x2b4   : > { %v2798_v22 = vpop.f32.mrb[14].mxu1  ;;  %v2201_v7 = vadd.f32 %v2685_v53, %v2200_v2 }
 0x2b5   : > { %v2212_v5 = vadd.f32 %v2798_v22, %v2685_v53  ;;  %v2203_v6 = vpop.f32.mrb[15].mxu1 }
 0x2b6   : > { %v2204_v8 = vadd.f32 %v2685_v53, %v2203_v6 }
 0x2b7   : > { %v2751_v9 = vpack.c.bf16 %v2212_v5, %v2209_v4 }
 0x2b8   : > { %v2746_v11 = vpack.c.bf16 %v2204_v8, %v2201_v7 }
 0x2b9   : > { %2775 = vst [vmem:[%s3866_s12 + $0x18] sm:$0xff] %v2751_v9  }
 0x2ba   : > { %2774 = vst [vmem:[%s3866_s12 + $0x10] sm:$0xff] %v2746_v11  }
 0x2d9   : > { %v2801_v38 = vpop.f32.mrb[16].mxu1 }
 0x2da   : > { %v2216_v59 = vpop.f32.mrb[17].mxu1  ;;  %v2225_v13 = vadd.f32 %v2801_v38, %v2685_v53 }
 0x2db   : > { %v2802_v12 = vpop.f32.mrb[18].mxu1  ;;  %v2217_v10 = vadd.f32 %v2685_v53, %v2216_v59 }
 0x2dc   : > { %v2228_v15 = vadd.f32 %v2802_v12, %v2685_v53  ;;  %v2219_v16 = vpop.f32.mrb[19].mxu1 }
 0x2dd   : > { %v2220_v17 = vadd.f32 %v2685_v53, %v2219_v16 }
 0x2de   : > { %v2761_v19 = vpack.c.bf16 %v2228_v15, %v2225_v13 }
 0x2df   : > { %v2756_v20 = vpack.c.bf16 %v2220_v17, %v2217_v10 }
 0x2e0   : > { %2777 = vst [vmem:[%s3866_s12 + $0x28] sm:$0xff] %v2761_v19  }
 0x2e1   : > { %2776 = vst [vmem:[%s3866_s12 + $0x20] sm:$0xff] %v2756_v20  }
 0x2f0   : > { %v2805_v21 = vpop.f32.mrb[20].mxu1 }
 0x2f1   : > { %v2232_v23 = vpop.f32.mrb[21].mxu1  ;;  %v2241_v25 = vadd.f32 %v2805_v21, %v2685_v53 }
 0x2f2   : > { %v2806_v24 = vpop.f32.mrb[22].mxu1  ;;  %v2233_v27 = vadd.f32 %v2685_v53, %v2232_v23 }
 0x2f3   : > { %v2244_v26 = vadd.f32 %v2806_v24, %v2685_v53  ;;  %v2235_v3 = vpop.f32.mrb[23].mxu1 }
 0x2f4   : > { %v2236_v29 = vadd.f32 %v2685_v53, %v2235_v3 }
 0x2f5   : > { %v2771_v0 = vpack.c.bf16 %v2244_v26, %v2241_v25 }
 0x2f6   : > { %v2766_v30 = vpack.c.bf16 %v2236_v29, %v2233_v27 }
 0x2f7   : > { %2779 = vst [vmem:[%s3866_s12 + $0x38] sm:$0xff] %v2771_v0  }
 0x2f8   : > { %2778 = vst [vmem:[%s3866_s12 + $0x30] sm:$0xff] %v2766_v30  }
 0x2f9   : > { %3017 = shalt.err (!%p3014_p6)
}
 0x2fa   : > { %s3018_s13 = scalar_lea.hbm %s3880_s21, 1024  ;;  %s3022_s9 = scalar_lea.hbm %s3947_s5, 4096 }
 0x2fb   : > { %p3019_p7 = scmp.ne.s32.totalorder %s3880_s21, %s3018_s13  ;;  %p3023_p11 = scmp.lt.u32.totalorder %s3880_s21, %s3947_s5 }
 0x2fc   : > { %p3024_p12 = scmp.lt.u32.totalorder %s3022_s9, %s3018_s13  ;;  %p3026_p0 = scmp.lt.u32.totalorder %s3018_s13, %s3880_s21 }
 0x2fd   : > { %p3020_p9 = pnand %p3019_p7, %p3191_p3 }
 0x2fe   : > { %p3025_p13 = por %p3024_p12, %p3023_p11 }
 0x2ff   : > { %p3021_p10 = pneg %p3020_p9 }
 0x300   : > { %p3027_p1 = por %p3026_p0, %p3025_p13 }
 0x302   : > { %p3028_p2 = pnand %p3027_p1, %p3021_p10 }
 0x304   : > { %3031 = shalt.err (!%p3028_p2)
}
 0x305   : > { %s3109_s16 = smov 4  }
 0x306   : > { %2827 = dma.vmem_to_hbm [thread:$0]  (%p3191_p3), %s3882_s15, 1024, %s3880_s21, %s3888_s22, %s3104_s10, %s3104_s10, %s3109_s16  }
 0x307 PF: > { %p2833_p4 = scmp.ge.s32.totalorder %s3098_s25, 2  ;;  %s2358_s17 = sand.u32 1, %s3070_s18  }
 0x308   : > { %s2359_s14 = scalar_lea.sflag [#allocation4], %s2358_s17 }
 0x309   : > { %p2830_p5 = pnand %p2833_p4, %p3200_p8 }
 0x30b   : > { %3065 = dma.done.wait (!%p2830_p5), %s2359_s14, 1024  }
 0x30c   : > { %3067 = vsyncadd (!%p2830_p5), %s2359_s14, 4294966272  ;;  %s18_s25 = sadd.s32 1, %s3098_s25   ;;  %s3954_s18 = smov %s3074_s19 }
 0x30d   : > { %p15_p6 = scmp.ge.s32.totalorder %s18_s25, 6   ;;  %s3955_s19 = smov %s3078_s20 }
 0x30e   : > { %s3956_s20 = smov %s3209_s11  ;;  %s3957_s21 = smov %s3090_s23 }
 0x30f   : > { %s3958_s22 = smov %s3094_s24  ;;  %s3959_s23 = smov %s3962_s28 }
 0x310   : > { %s3960_s24 = smov %s3966_s29  ;;  %17 = sbr.rel (!%p15_p6) target bundleno = 5 (0x5), region = 78 }
 0x317   :  { %2364 = vsyncpa [#allocation4], 1 }
 0x318   :  { %2366 = vsyncpa [#allocation4 + $0x1], 1 }

</bundles_post_ra>
